<compile_context>
chip_gen: v6e
topology: v6e:2x2x1
jax: 0.10.0
libtpu: 0.0.40
codegen_flags: <defaults>
</compile_context>

<pallas_src>
import functools

import jax
import jax.numpy as jnp
from jax.experimental import pallas as pl
from jax.experimental.pallas import tpu as pltpu


def _round_up(x, m):
    return (x + m - 1) // m * m


def _tree_sum(vals):
    """Pairwise tree reduction (shorter VPU dependency chain than a left fold)."""
    vals = list(vals)
    while len(vals) > 1:
        nxt = [a + b for a, b in zip(vals[0::2], vals[1::2])]
        if len(vals) % 2:
            nxt.append(vals[-1])
        vals = nxt
    return vals[0]


def _dm_kernel(doc_ids_ref, ctx_ids_ref, tgt_ids_ref,   # scalar-prefetch ids (SMEM, flat)
               d_ref, w_ref, ot_ref,                     # VMEM-resident tables (V on lanes)
               out_ref,                                  # (TB, K) output block
               x_scr, og_scr,                            # VMEM scratch
               *, block_b, num_ctx, num_tgt):
    i = pl.program_id(0)
    base = i * block_b

    # Row-wise in-kernel gathers (dynamic sublane-row loads from VMEM tables).
    for r in range(block_b):                       # static unroll; block_b kept small
        b = base + r
        # x = D[doc_ids[b]] + sum_c W[context_ids[b, c]]  -- tree of (1, Vp) VPU adds
        rows = [d_ref[pl.ds(doc_ids_ref[b], 1), :]]
        for c in range(num_ctx):
            rows.append(w_ref[pl.ds(ctx_ids_ref[b * num_ctx + c], 1), :])
        x_scr[pl.ds(r, 1), :] = _tree_sum(rows)
        # Gather the K target/noise rows of O^T (V on the lane axis).
        for k in range(num_tgt):
            o_row = ot_ref[pl.ds(tgt_ids_ref[b * num_tgt + k], 1), :]   # (1, Vp)
            og_scr[pl.ds(r, 1), pl.ds(k, 1), :] = o_row[None]

    # Vectorized score contraction over the whole batch tile:
    #   scores[r, k] = sum_v x[r, v] * O^T[t[r, k], v]
    x_tile = x_scr[...]                             # (TB, Vp)    f32
    o_tile = og_scr[...]                            # (TB, K, Vp) f32
    scores = jnp.sum(o_tile * x_tile[:, None, :], axis=-1)      # (TB, K) f32
    out_ref[...] = scores.astype(out_ref.dtype)


def dm_forward(D, W, O, context_ids, doc_ids, target_noise_ids, *, block_b=None):
    """Pallas TPU forward of DM: scores[b,k] = (D[doc_b] + sum_c W[ctx_bc]) . O[:, tgt_bk]."""
    B, C = context_ids.shape
    K = target_noise_ids.shape[1]
    num_docs, V = D.shape
    num_words = W.shape[0]

    # ---- layout plumbing (one-time, cheap relative to per-row HBM remat) ----
    # O is stored (vec_dim, num_words); transpose once so target gathers are
    # contiguous rows with V on the lane axis.  Pad V to a 128-lane multiple so
    # no vector op needs masking (zero pad does not change the dot products).
    Vp = _round_up(V, 128)
    pad_v = Vp - V
    Df = jnp.pad(D.astype(jnp.float32), ((0, 0), (0, pad_v)))            # (num_docs, Vp)
    Wf = jnp.pad(W.astype(jnp.float32), ((0, 0), (0, pad_v)))            # (num_words, Vp)
    OTf = jnp.pad(jnp.transpose(O).astype(jnp.float32), ((0, 0), (0, pad_v)))  # (num_words, Vp)

    # Batch tile: small (row-gathers are unrolled in the kernel), multiple of 8.
    if block_b is None:
        block_b = min(16, _round_up(B, 8))
    block_b = max(8, _round_up(block_b, 8))
    Bp = _round_up(B, block_b)
    pad_b = Bp - B

    # Pad id arrays with valid (0) indices for the padded tail rows; flatten the
    # 2-D id arrays so SMEM padding stays tiny (1-D, long axis only).
    doc_p = jnp.pad(doc_ids.astype(jnp.int32), (0, pad_b)).reshape(Bp)
    ctx_p = jnp.pad(context_ids.astype(jnp.int32), ((0, pad_b), (0, 0))).reshape(Bp * C)
    tgt_p = jnp.pad(target_noise_ids.astype(jnp.int32), ((0, pad_b), (0, 0))).reshape(Bp * K)

    kernel = functools.partial(_dm_kernel, block_b=block_b, num_ctx=C, num_tgt=K)

    # Explicit VMEM budget (tables possibly double-buffered + output + scratch),
    # capped at 64 MiB so the request is valid on v7x's 64 MiB/TC as well.
    table_bytes = 4 * (Df.size + Wf.size + OTf.size)
    vmem_bytes = (2 * table_bytes
                  + 4 * (2 * block_b * K + block_b * Vp + block_b * K * Vp)
                  + (1 << 20))
    vmem_bytes = int(min(max(vmem_bytes, 4 << 20), 64 << 20))

    cost = pl.CostEstimate(
        flops=2 * B * V * (C + K),
        transcendentals=0,
        bytes_accessed=int(table_bytes + 4 * Bp * K + 4 * Bp * (1 + C + K)),
    )

    grid_spec = pltpu.PrefetchScalarGridSpec(
        num_scalar_prefetch=3,
        grid=(Bp // block_b,),
        in_specs=[
            pl.BlockSpec((num_docs, Vp), lambda i, *_: (0, 0)),    # D   resident in VMEM
            pl.BlockSpec((num_words, Vp), lambda i, *_: (0, 0)),   # W   resident in VMEM
            pl.BlockSpec((num_words, Vp), lambda i, *_: (0, 0)),   # O^T resident in VMEM
        ],
        out_specs=pl.BlockSpec((block_b, K), lambda i, *_: (i, 0)),
        scratch_shapes=[
            pltpu.VMEM((block_b, Vp), jnp.float32),        # x tile
            pltpu.VMEM((block_b, K, Vp), jnp.float32),     # gathered O^T rows
        ],
    )

    out = pl.pallas_call(
        kernel,
        grid_spec=grid_spec,
        out_shape=jax.ShapeDtypeStruct((Bp, K), jnp.float32),
        compiler_params=pltpu.CompilerParams(
            dimension_semantics=("parallel",),
            vmem_limit_bytes=vmem_bytes,
        ),
        cost_estimate=cost,
    )(doc_p, ctx_p, tgt_p, Df, Wf, OTf)

    return out[:B]


def dm_reference(D, W, O, context_ids, doc_ids, target_noise_ids):
    x = D[doc_ids, :] + jnp.sum(W[context_ids, :], axis=1)
    o_tgt = jnp.transpose(O[:, target_noise_ids], (1, 0, 2))
    return jnp.einsum("bv,bvk->bk", x, o_tgt)


if __name__ == "__main__":
    # Small deterministic shapes consistent with the module's forward.
    vec_dim = 32
    num_docs = 8
    num_words = 16
    batch = 2
    num_context_words = 4
    num_noise_plus_1 = 4

    key = jax.random.PRNGKey(0)
    kD, kW, kO, kc, kd, kt = jax.random.split(key, 6)

    # Parameters (shapes from DM.__init__).  Note: PyTorch inits O to zeros;
    # a small deterministic random O makes the output non-trivial.
    D = jax.random.normal(kD, (num_docs, vec_dim), dtype=jnp.float32)
    W = jax.random.normal(kW, (num_words, vec_dim), dtype=jnp.float32)
    O = 0.1 * jax.random.normal(kO, (vec_dim, num_words), dtype=jnp.float32)

    context_ids = jax.random.randint(
        kc, (batch, num_context_words), 0, num_words, dtype=jnp.int32
    )
    doc_ids = jax.random.randint(kd, (batch,), 0, num_docs, dtype=jnp.int32)
    target_noise_ids = jax.random.randint(
        kt, (batch, num_noise_plus_1), 0, num_words, dtype=jnp.int32
    )

    scores = dm_forward(D, W, O, context_ids, doc_ids, target_noise_ids)
    scores = jax.block_until_ready(scores)

    ref = dm_reference(D, W, O, context_ids, doc_ids, target_noise_ids)
    assert scores.shape == (batch, num_noise_plus_1)
    assert jnp.allclose(scores, ref, atol=1e-4, rtol=1e-4), (scores, ref)

    print("KERNEL_OK")
</pallas_src>

<mosaic_0001>
module attributes {stable_mosaic.version = 11 : i64} {
  func.func @_dm_kernel(%arg0: i32, %arg1: memref<8xi32, #tpu.memory_space<smem>>, %arg2: memref<32xi32, #tpu.memory_space<smem>>, %arg3: memref<32xi32, #tpu.memory_space<smem>>, %arg4: memref<8x128xf32, #tpu.memory_space<vmem>>, %arg5: memref<16x128xf32, #tpu.memory_space<vmem>>, %arg6: memref<16x128xf32, #tpu.memory_space<vmem>>, %arg7: memref<8x4xf32, #tpu.memory_space<vmem>>, %arg8: memref<8x128xf32, #tpu.memory_space<vmem>>, %arg9: memref<8x4x128xf32, #tpu.memory_space<vmem>>) attributes {dimension_semantics = [#tpu.dimension_semantics<parallel>], iteration_bounds = array<i64: 1>, scalar_prefetch = 3 : i64, scratch_operands = 2 : i64, tpu.core_type = #tpu.core_type<tc>, window_params = [{pipeline_mode = #tpu.pipeline_mode<synchronous>, transform_indices = @transform_0, window_bounds = array<i64: 8, 128>}, {pipeline_mode = #tpu.pipeline_mode<synchronous>, transform_indices = @transform_1, window_bounds = array<i64: 16, 128>}, {pipeline_mode = #tpu.pipeline_mode<synchronous>, transform_indices = @transform_2, window_bounds = array<i64: 16, 128>}, {transform_indices = @transform_3, window_bounds = array<i64: 8, 4>}]} {
    %c8_i32 = arith.constant 8 : i32
    %0 = arith.muli %arg0, %c8_i32 : i32
    %c0_i32 = arith.constant 0 : i32
    %1 = arith.addi %0, %c0_i32 : i32
    %2 = arith.index_cast %1 : i32 to index
    %3 = memref.load %arg1[%2] : memref<8xi32, #tpu.memory_space<smem>>
    %4 = arith.index_cast %3 : i32 to index
    %c0 = arith.constant 0 : index
    %5 = vector.load %arg4[%4, %c0] : memref<8x128xf32, #tpu.memory_space<vmem>>, vector<1x128xf32>
    %c4_i32 = arith.constant 4 : i32
    %6 = arith.muli %1, %c4_i32 : i32
    %c0_i32_0 = arith.constant 0 : i32
    %7 = arith.addi %6, %c0_i32_0 : i32
    %8 = arith.index_cast %7 : i32 to index
    %9 = memref.load %arg2[%8] : memref<32xi32, #tpu.memory_space<smem>>
    %10 = arith.index_cast %9 : i32 to index
    %c0_1 = arith.constant 0 : index
    %11 = vector.load %arg5[%10, %c0_1] : memref<16x128xf32, #tpu.memory_space<vmem>>, vector<1x128xf32>
    %c4_i32_2 = arith.constant 4 : i32
    %12 = arith.muli %1, %c4_i32_2 : i32
    %c1_i32 = arith.constant 1 : i32
    %13 = arith.addi %12, %c1_i32 : i32
    %14 = arith.index_cast %13 : i32 to index
    %15 = memref.load %arg2[%14] : memref<32xi32, #tpu.memory_space<smem>>
    %16 = arith.index_cast %15 : i32 to index
    %c0_3 = arith.constant 0 : index
    %17 = vector.load %arg5[%16, %c0_3] : memref<16x128xf32, #tpu.memory_space<vmem>>, vector<1x128xf32>
    %c4_i32_4 = arith.constant 4 : i32
    %18 = arith.muli %1, %c4_i32_4 : i32
    %c2_i32 = arith.constant 2 : i32
    %19 = arith.addi %18, %c2_i32 : i32
    %20 = arith.index_cast %19 : i32 to index
    %21 = memref.load %arg2[%20] : memref<32xi32, #tpu.memory_space<smem>>
    %22 = arith.index_cast %21 : i32 to index
    %c0_5 = arith.constant 0 : index
    %23 = vector.load %arg5[%22, %c0_5] : memref<16x128xf32, #tpu.memory_space<vmem>>, vector<1x128xf32>
    %c4_i32_6 = arith.constant 4 : i32
    %24 = arith.muli %1, %c4_i32_6 : i32
    %c3_i32 = arith.constant 3 : i32
    %25 = arith.addi %24, %c3_i32 : i32
    %26 = arith.index_cast %25 : i32 to index
    %27 = memref.load %arg2[%26] : memref<32xi32, #tpu.memory_space<smem>>
    %28 = arith.index_cast %27 : i32 to index
    %c0_7 = arith.constant 0 : index
    %29 = vector.load %arg5[%28, %c0_7] : memref<16x128xf32, #tpu.memory_space<vmem>>, vector<1x128xf32>
    %30 = arith.addf %5, %11 : vector<1x128xf32>
    %31 = arith.addf %17, %23 : vector<1x128xf32>
    %32 = arith.addf %30, %31 : vector<1x128xf32>
    %33 = arith.addf %32, %29 : vector<1x128xf32>
    %c0_8 = arith.constant 0 : index
    %c0_9 = arith.constant 0 : index
    %34 = vector.load %arg8[%c0_8, %c0_9] : memref<8x128xf32, #tpu.memory_space<vmem>>, vector<1x128xf32>
    tpu.vector_store %arg8[%c0_8, %c0_9], %33 {strides = array<i32>} : memref<8x128xf32, #tpu.memory_space<vmem>>, vector<1x128xf32>,
    %c4_i32_10 = arith.constant 4 : i32
    %35 = arith.muli %1, %c4_i32_10 : i32
    %c0_i32_11 = arith.constant 0 : i32
    %36 = arith.addi %35, %c0_i32_11 : i32
    %37 = arith.index_cast %36 : i32 to index
    %38 = memref.load %arg3[%37] : memref<32xi32, #tpu.memory_space<smem>>
    %39 = arith.index_cast %38 : i32 to index
    %c0_12 = arith.constant 0 : index
    %40 = vector.load %arg6[%39, %c0_12] : memref<16x128xf32, #tpu.memory_space<vmem>>, vector<1x128xf32>
    %41 = vector.shape_cast %40 : vector<1x128xf32> to vector<1x1x128xf32>
    %c0_13 = arith.constant 0 : index
    %c0_14 = arith.constant 0 : index
    %c0_15 = arith.constant 0 : index
    %42 = vector.load %arg9[%c0_13, %c0_14, %c0_15] : memref<8x4x128xf32, #tpu.memory_space<vmem>>, vector<1x1x128xf32>
    tpu.vector_store %arg9[%c0_13, %c0_14, %c0_15], %41 {strides = array<i32>} : memref<8x4x128xf32, #tpu.memory_space<vmem>>, vector<1x1x128xf32>,
    %c4_i32_16 = arith.constant 4 : i32
    %43 = arith.muli %1, %c4_i32_16 : i32
    %c1_i32_17 = arith.constant 1 : i32
    %44 = arith.addi %43, %c1_i32_17 : i32
    %45 = arith.index_cast %44 : i32 to index
    %46 = memref.load %arg3[%45] : memref<32xi32, #tpu.memory_space<smem>>
    %47 = arith.index_cast %46 : i32 to index
    %c0_18 = arith.constant 0 : index
    %48 = vector.load %arg6[%47, %c0_18] : memref<16x128xf32, #tpu.memory_space<vmem>>, vector<1x128xf32>
    %49 = vector.shape_cast %48 : vector<1x128xf32> to vector<1x1x128xf32>
    %c0_19 = arith.constant 0 : index
    %c1 = arith.constant 1 : index
    %c0_20 = arith.constant 0 : index
    %50 = vector.load %arg9[%c0_19, %c1, %c0_20] : memref<8x4x128xf32, #tpu.memory_space<vmem>>, vector<1x1x128xf32>
    tpu.vector_store %arg9[%c0_19, %c1, %c0_20], %49 {strides = array<i32>} : memref<8x4x128xf32, #tpu.memory_space<vmem>>, vector<1x1x128xf32>,
    %c4_i32_21 = arith.constant 4 : i32
    %51 = arith.muli %1, %c4_i32_21 : i32
    %c2_i32_22 = arith.constant 2 : i32
    %52 = arith.addi %51, %c2_i32_22 : i32
    %53 = arith.index_cast %52 : i32 to index
    %54 = memref.load %arg3[%53] : memref<32xi32, #tpu.memory_space<smem>>
    %55 = arith.index_cast %54 : i32 to index
    %c0_23 = arith.constant 0 : index
    %56 = vector.load %arg6[%55, %c0_23] : memref<16x128xf32, #tpu.memory_space<vmem>>, vector<1x128xf32>
    %57 = vector.shape_cast %56 : vector<1x128xf32> to vector<1x1x128xf32>
    %c0_24 = arith.constant 0 : index
    %c2 = arith.constant 2 : index
    %c0_25 = arith.constant 0 : index
    %58 = vector.load %arg9[%c0_24, %c2, %c0_25] : memref<8x4x128xf32, #tpu.memory_space<vmem>>, vector<1x1x128xf32>
    tpu.vector_store %arg9[%c0_24, %c2, %c0_25], %57 {strides = array<i32>} : memref<8x4x128xf32, #tpu.memory_space<vmem>>, vector<1x1x128xf32>,
    %c4_i32_26 = arith.constant 4 : i32
    %59 = arith.muli %1, %c4_i32_26 : i32
    %c3_i32_27 = arith.constant 3 : i32
    %60 = arith.addi %59, %c3_i32_27 : i32
    %61 = arith.index_cast %60 : i32 to index
    %62 = memref.load %arg3[%61] : memref<32xi32, #tpu.memory_space<smem>>
    %63 = arith.index_cast %62 : i32 to index
    %c0_28 = arith.constant 0 : index
    %64 = vector.load %arg6[%63, %c0_28] : memref<16x128xf32, #tpu.memory_space<vmem>>, vector<1x128xf32>
    %65 = vector.shape_cast %64 : vector<1x128xf32> to vector<1x1x128xf32>
    %c0_29 = arith.constant 0 : index
    %c3 = arith.constant 3 : index
    %c0_30 = arith.constant 0 : index
    %66 = vector.load %arg9[%c0_29, %c3, %c0_30] : memref<8x4x128xf32, #tpu.memory_space<vmem>>, vector<1x1x128xf32>
    tpu.vector_store %arg9[%c0_29, %c3, %c0_30], %65 {strides = array<i32>} : memref<8x4x128xf32, #tpu.memory_space<vmem>>, vector<1x1x128xf32>,
    %c1_i32_31 = arith.constant 1 : i32
    %67 = arith.addi %0, %c1_i32_31 : i32
    %68 = arith.index_cast %67 : i32 to index
    %69 = memref.load %arg1[%68] : memref<8xi32, #tpu.memory_space<smem>>
    %70 = arith.index_cast %69 : i32 to index
    %c0_32 = arith.constant 0 : index
    %71 = vector.load %arg4[%70, %c0_32] : memref<8x128xf32, #tpu.memory_space<vmem>>, vector<1x128xf32>
    %c4_i32_33 = arith.constant 4 : i32
    %72 = arith.muli %67, %c4_i32_33 : i32
    %c0_i32_34 = arith.constant 0 : i32
    %73 = arith.addi %72, %c0_i32_34 : i32
    %74 = arith.index_cast %73 : i32 to index
    %75 = memref.load %arg2[%74] : memref<32xi32, #tpu.memory_space<smem>>
    %76 = arith.index_cast %75 : i32 to index
    %c0_35 = arith.constant 0 : index
    %77 = vector.load %arg5[%76, %c0_35] : memref<16x128xf32, #tpu.memory_space<vmem>>, vector<1x128xf32>
    %c4_i32_36 = arith.constant 4 : i32
    %78 = arith.muli %67, %c4_i32_36 : i32
    %c1_i32_37 = arith.constant 1 : i32
    %79 = arith.addi %78, %c1_i32_37 : i32
    %80 = arith.index_cast %79 : i32 to index
    %81 = memref.load %arg2[%80] : memref<32xi32, #tpu.memory_space<smem>>
    %82 = arith.index_cast %81 : i32 to index
    %c0_38 = arith.constant 0 : index
    %83 = vector.load %arg5[%82, %c0_38] : memref<16x128xf32, #tpu.memory_space<vmem>>, vector<1x128xf32>
    %c4_i32_39 = arith.constant 4 : i32
    %84 = arith.muli %67, %c4_i32_39 : i32
    %c2_i32_40 = arith.constant 2 : i32
    %85 = arith.addi %84, %c2_i32_40 : i32
    %86 = arith.index_cast %85 : i32 to index
    %87 = memref.load %arg2[%86] : memref<32xi32, #tpu.memory_space<smem>>
    %88 = arith.index_cast %87 : i32 to index
    %c0_41 = arith.constant 0 : index
    %89 = vector.load %arg5[%88, %c0_41] : memref<16x128xf32, #tpu.memory_space<vmem>>, vector<1x128xf32>
    %c4_i32_42 = arith.constant 4 : i32
    %90 = arith.muli %67, %c4_i32_42 : i32
    %c3_i32_43 = arith.constant 3 : i32
    %91 = arith.addi %90, %c3_i32_43 : i32
    %92 = arith.index_cast %91 : i32 to index
    %93 = memref.load %arg2[%92] : memref<32xi32, #tpu.memory_space<smem>>
    %94 = arith.index_cast %93 : i32 to index
    %c0_44 = arith.constant 0 : index
    %95 = vector.load %arg5[%94, %c0_44] : memref<16x128xf32, #tpu.memory_space<vmem>>, vector<1x128xf32>
    %96 = arith.addf %71, %77 : vector<1x128xf32>
    %97 = arith.addf %83, %89 : vector<1x128xf32>
    %98 = arith.addf %96, %97 : vector<1x128xf32>
    %99 = arith.addf %98, %95 : vector<1x128xf32>
    %c1_45 = arith.constant 1 : index
    %c0_46 = arith.constant 0 : index
    %100 = vector.load %arg8[%c1_45, %c0_46] : memref<8x128xf32, #tpu.memory_space<vmem>>, vector<1x128xf32>
    tpu.vector_store %arg8[%c1_45, %c0_46], %99 {strides = array<i32>} : memref<8x128xf32, #tpu.memory_space<vmem>>, vector<1x128xf32>,
    %c4_i32_47 = arith.constant 4 : i32
    %101 = arith.muli %67, %c4_i32_47 : i32
    %c0_i32_48 = arith.constant 0 : i32
    %102 = arith.addi %101, %c0_i32_48 : i32
    %103 = arith.index_cast %102 : i32 to index
    %104 = memref.load %arg3[%103] : memref<32xi32, #tpu.memory_space<smem>>
    %105 = arith.index_cast %104 : i32 to index
    %c0_49 = arith.constant 0 : index
    %106 = vector.load %arg6[%105, %c0_49] : memref<16x128xf32, #tpu.memory_space<vmem>>, vector<1x128xf32>
    %107 = vector.shape_cast %106 : vector<1x128xf32> to vector<1x1x128xf32>
    %c1_50 = arith.constant 1 : index
    %c0_51 = arith.constant 0 : index
    %c0_52 = arith.constant 0 : index
    %108 = vector.load %arg9[%c1_50, %c0_51, %c0_52] : memref<8x4x128xf32, #tpu.memory_space<vmem>>, vector<1x1x128xf32>
    tpu.vector_store %arg9[%c1_50, %c0_51, %c0_52], %107 {strides = array<i32>} : memref<8x4x128xf32, #tpu.memory_space<vmem>>, vector<1x1x128xf32>,
    %c4_i32_53 = arith.constant 4 : i32
    %109 = arith.muli %67, %c4_i32_53 : i32
    %c1_i32_54 = arith.constant 1 : i32
    %110 = arith.addi %109, %c1_i32_54 : i32
    %111 = arith.index_cast %110 : i32 to index
    %112 = memref.load %arg3[%111] : memref<32xi32, #tpu.memory_space<smem>>
    %113 = arith.index_cast %112 : i32 to index
    %c0_55 = arith.constant 0 : index
    %114 = vector.load %arg6[%113, %c0_55] : memref<16x128xf32, #tpu.memory_space<vmem>>, vector<1x128xf32>
    %115 = vector.shape_cast %114 : vector<1x128xf32> to vector<1x1x128xf32>
    %c1_56 = arith.constant 1 : index
    %c1_57 = arith.constant 1 : index
    %c0_58 = arith.constant 0 : index
    %116 = vector.load %arg9[%c1_56, %c1_57, %c0_58] : memref<8x4x128xf32, #tpu.memory_space<vmem>>, vector<1x1x128xf32>
    tpu.vector_store %arg9[%c1_56, %c1_57, %c0_58], %115 {strides = array<i32>} : memref<8x4x128xf32, #tpu.memory_space<vmem>>, vector<1x1x128xf32>,
    %c4_i32_59 = arith.constant 4 : i32
    %117 = arith.muli %67, %c4_i32_59 : i32
    %c2_i32_60 = arith.constant 2 : i32
    %118 = arith.addi %117, %c2_i32_60 : i32
    %119 = arith.index_cast %118 : i32 to index
    %120 = memref.load %arg3[%119] : memref<32xi32, #tpu.memory_space<smem>>
    %121 = arith.index_cast %120 : i32 to index
    %c0_61 = arith.constant 0 : index
    %122 = vector.load %arg6[%121, %c0_61] : memref<16x128xf32, #tpu.memory_space<vmem>>, vector<1x128xf32>
    %123 = vector.shape_cast %122 : vector<1x128xf32> to vector<1x1x128xf32>
    %c1_62 = arith.constant 1 : index
    %c2_63 = arith.constant 2 : index
    %c0_64 = arith.constant 0 : index
    %124 = vector.load %arg9[%c1_62, %c2_63, %c0_64] : memref<8x4x128xf32, #tpu.memory_space<vmem>>, vector<1x1x128xf32>
    tpu.vector_store %arg9[%c1_62, %c2_63, %c0_64], %123 {strides = array<i32>} : memref<8x4x128xf32, #tpu.memory_space<vmem>>, vector<1x1x128xf32>,
    %c4_i32_65 = arith.constant 4 : i32
    %125 = arith.muli %67, %c4_i32_65 : i32
    %c3_i32_66 = arith.constant 3 : i32
    %126 = arith.addi %125, %c3_i32_66 : i32
    %127 = arith.index_cast %126 : i32 to index
    %128 = memref.load %arg3[%127] : memref<32xi32, #tpu.memory_space<smem>>
    %129 = arith.index_cast %128 : i32 to index
    %c0_67 = arith.constant 0 : index
    %130 = vector.load %arg6[%129, %c0_67] : memref<16x128xf32, #tpu.memory_space<vmem>>, vector<1x128xf32>
    %131 = vector.shape_cast %130 : vector<1x128xf32> to vector<1x1x128xf32>
    %c1_68 = arith.constant 1 : index
    %c3_69 = arith.constant 3 : index
    %c0_70 = arith.constant 0 : index
    %132 = vector.load %arg9[%c1_68, %c3_69, %c0_70] : memref<8x4x128xf32, #tpu.memory_space<vmem>>, vector<1x1x128xf32>
    tpu.vector_store %arg9[%c1_68, %c3_69, %c0_70], %131 {strides = array<i32>} : memref<8x4x128xf32, #tpu.memory_space<vmem>>, vector<1x1x128xf32>,
    %c2_i32_71 = arith.constant 2 : i32
    %133 = arith.addi %0, %c2_i32_71 : i32
    %134 = arith.index_cast %133 : i32 to index
    %135 = memref.load %arg1[%134] : memref<8xi32, #tpu.memory_space<smem>>
    %136 = arith.index_cast %135 : i32 to index
    %c0_72 = arith.constant 0 : index
    %137 = vector.load %arg4[%136, %c0_72] : memref<8x128xf32, #tpu.memory_space<vmem>>, vector<1x128xf32>
    %c4_i32_73 = arith.constant 4 : i32
    %138 = arith.muli %133, %c4_i32_73 : i32
    %c0_i32_74 = arith.constant 0 : i32
    %139 = arith.addi %138, %c0_i32_74 : i32
    %140 = arith.index_cast %139 : i32 to index
    %141 = memref.load %arg2[%140] : memref<32xi32, #tpu.memory_space<smem>>
    %142 = arith.index_cast %141 : i32 to index
    %c0_75 = arith.constant 0 : index
    %143 = vector.load %arg5[%142, %c0_75] : memref<16x128xf32, #tpu.memory_space<vmem>>, vector<1x128xf32>
    %c4_i32_76 = arith.constant 4 : i32
    %144 = arith.muli %133, %c4_i32_76 : i32
    %c1_i32_77 = arith.constant 1 : i32
    %145 = arith.addi %144, %c1_i32_77 : i32
    %146 = arith.index_cast %145 : i32 to index
    %147 = memref.load %arg2[%146] : memref<32xi32, #tpu.memory_space<smem>>
    %148 = arith.index_cast %147 : i32 to index
    %c0_78 = arith.constant 0 : index
    %149 = vector.load %arg5[%148, %c0_78] : memref<16x128xf32, #tpu.memory_space<vmem>>, vector<1x128xf32>
    %c4_i32_79 = arith.constant 4 : i32
    %150 = arith.muli %133, %c4_i32_79 : i32
    %c2_i32_80 = arith.constant 2 : i32
    %151 = arith.addi %150, %c2_i32_80 : i32
    %152 = arith.index_cast %151 : i32 to index
    %153 = memref.load %arg2[%152] : memref<32xi32, #tpu.memory_space<smem>>
    %154 = arith.index_cast %153 : i32 to index
    %c0_81 = arith.constant 0 : index
    %155 = vector.load %arg5[%154, %c0_81] : memref<16x128xf32, #tpu.memory_space<vmem>>, vector<1x128xf32>
    %c4_i32_82 = arith.constant 4 : i32
    %156 = arith.muli %133, %c4_i32_82 : i32
    %c3_i32_83 = arith.constant 3 : i32
    %157 = arith.addi %156, %c3_i32_83 : i32
    %158 = arith.index_cast %157 : i32 to index
    %159 = memref.load %arg2[%158] : memref<32xi32, #tpu.memory_space<smem>>
    %160 = arith.index_cast %159 : i32 to index
    %c0_84 = arith.constant 0 : index
    %161 = vector.load %arg5[%160, %c0_84] : memref<16x128xf32, #tpu.memory_space<vmem>>, vector<1x128xf32>
    %162 = arith.addf %137, %143 : vector<1x128xf32>
    %163 = arith.addf %149, %155 : vector<1x128xf32>
    %164 = arith.addf %162, %163 : vector<1x128xf32>
    %165 = arith.addf %164, %161 : vector<1x128xf32>
    %c2_85 = arith.constant 2 : index
    %c0_86 = arith.constant 0 : index
    %166 = vector.load %arg8[%c2_85, %c0_86] : memref<8x128xf32, #tpu.memory_space<vmem>>, vector<1x128xf32>
    tpu.vector_store %arg8[%c2_85, %c0_86], %165 {strides = array<i32>} : memref<8x128xf32, #tpu.memory_space<vmem>>, vector<1x128xf32>,
    %c4_i32_87 = arith.constant 4 : i32
    %167 = arith.muli %133, %c4_i32_87 : i32
    %c0_i32_88 = arith.constant 0 : i32
    %168 = arith.addi %167, %c0_i32_88 : i32
    %169 = arith.index_cast %168 : i32 to index
    %170 = memref.load %arg3[%169] : memref<32xi32, #tpu.memory_space<smem>>
    %171 = arith.index_cast %170 : i32 to index
    %c0_89 = arith.constant 0 : index
    %172 = vector.load %arg6[%171, %c0_89] : memref<16x128xf32, #tpu.memory_space<vmem>>, vector<1x128xf32>
    %173 = vector.shape_cast %172 : vector<1x128xf32> to vector<1x1x128xf32>
    %c2_90 = arith.constant 2 : index
    %c0_91 = arith.constant 0 : index
    %c0_92 = arith.constant 0 : index
    %174 = vector.load %arg9[%c2_90, %c0_91, %c0_92] : memref<8x4x128xf32, #tpu.memory_space<vmem>>, vector<1x1x128xf32>
    tpu.vector_store %arg9[%c2_90, %c0_91, %c0_92], %173 {strides = array<i32>} : memref<8x4x128xf32, #tpu.memory_space<vmem>>, vector<1x1x128xf32>,
    %c4_i32_93 = arith.constant 4 : i32
    %175 = arith.muli %133, %c4_i32_93 : i32
    %c1_i32_94 = arith.constant 1 : i32
    %176 = arith.addi %175, %c1_i32_94 : i32
    %177 = arith.index_cast %176 : i32 to index
    %178 = memref.load %arg3[%177] : memref<32xi32, #tpu.memory_space<smem>>
    %179 = arith.index_cast %178 : i32 to index
    %c0_95 = arith.constant 0 : index
    %180 = vector.load %arg6[%179, %c0_95] : memref<16x128xf32, #tpu.memory_space<vmem>>, vector<1x128xf32>
    %181 = vector.shape_cast %180 : vector<1x128xf32> to vector<1x1x128xf32>
    %c2_96 = arith.constant 2 : index
    %c1_97 = arith.constant 1 : index
    %c0_98 = arith.constant 0 : index
    %182 = vector.load %arg9[%c2_96, %c1_97, %c0_98] : memref<8x4x128xf32, #tpu.memory_space<vmem>>, vector<1x1x128xf32>
    tpu.vector_store %arg9[%c2_96, %c1_97, %c0_98], %181 {strides = array<i32>} : memref<8x4x128xf32, #tpu.memory_space<vmem>>, vector<1x1x128xf32>,
    %c4_i32_99 = arith.constant 4 : i32
    %183 = arith.muli %133, %c4_i32_99 : i32
    %c2_i32_100 = arith.constant 2 : i32
    %184 = arith.addi %183, %c2_i32_100 : i32
    %185 = arith.index_cast %184 : i32 to index
    %186 = memref.load %arg3[%185] : memref<32xi32, #tpu.memory_space<smem>>
    %187 = arith.index_cast %186 : i32 to index
    %c0_101 = arith.constant 0 : index
    %188 = vector.load %arg6[%187, %c0_101] : memref<16x128xf32, #tpu.memory_space<vmem>>, vector<1x128xf32>
    %189 = vector.shape_cast %188 : vector<1x128xf32> to vector<1x1x128xf32>
    %c2_102 = arith.constant 2 : index
    %c2_103 = arith.constant 2 : index
    %c0_104 = arith.constant 0 : index
    %190 = vector.load %arg9[%c2_102, %c2_103, %c0_104] : memref<8x4x128xf32, #tpu.memory_space<vmem>>, vector<1x1x128xf32>
    tpu.vector_store %arg9[%c2_102, %c2_103, %c0_104], %189 {strides = array<i32>} : memref<8x4x128xf32, #tpu.memory_space<vmem>>, vector<1x1x128xf32>,
    %c4_i32_105 = arith.constant 4 : i32
    %191 = arith.muli %133, %c4_i32_105 : i32
    %c3_i32_106 = arith.constant 3 : i32
    %192 = arith.addi %191, %c3_i32_106 : i32
    %193 = arith.index_cast %192 : i32 to index
    %194 = memref.load %arg3[%193] : memref<32xi32, #tpu.memory_space<smem>>
    %195 = arith.index_cast %194 : i32 to index
    %c0_107 = arith.constant 0 : index
    %196 = vector.load %arg6[%195, %c0_107] : memref<16x128xf32, #tpu.memory_space<vmem>>, vector<1x128xf32>
    %197 = vector.shape_cast %196 : vector<1x128xf32> to vector<1x1x128xf32>
    %c2_108 = arith.constant 2 : index
    %c3_109 = arith.constant 3 : index
    %c0_110 = arith.constant 0 : index
    %198 = vector.load %arg9[%c2_108, %c3_109, %c0_110] : memref<8x4x128xf32, #tpu.memory_space<vmem>>, vector<1x1x128xf32>
    tpu.vector_store %arg9[%c2_108, %c3_109, %c0_110], %197 {strides = array<i32>} : memref<8x4x128xf32, #tpu.memory_space<vmem>>, vector<1x1x128xf32>,
    %c3_i32_111 = arith.constant 3 : i32
    %199 = arith.addi %0, %c3_i32_111 : i32
    %200 = arith.index_cast %199 : i32 to index
    %201 = memref.load %arg1[%200] : memref<8xi32, #tpu.memory_space<smem>>
    %202 = arith.index_cast %201 : i32 to index
    %c0_112 = arith.constant 0 : index
    %203 = vector.load %arg4[%202, %c0_112] : memref<8x128xf32, #tpu.memory_space<vmem>>, vector<1x128xf32>
    %c4_i32_113 = arith.constant 4 : i32
    %204 = arith.muli %199, %c4_i32_113 : i32
    %c0_i32_114 = arith.constant 0 : i32
    %205 = arith.addi %204, %c0_i32_114 : i32
    %206 = arith.index_cast %205 : i32 to index
    %207 = memref.load %arg2[%206] : memref<32xi32, #tpu.memory_space<smem>>
    %208 = arith.index_cast %207 : i32 to index
    %c0_115 = arith.constant 0 : index
    %209 = vector.load %arg5[%208, %c0_115] : memref<16x128xf32, #tpu.memory_space<vmem>>, vector<1x128xf32>
    %c4_i32_116 = arith.constant 4 : i32
    %210 = arith.muli %199, %c4_i32_116 : i32
    %c1_i32_117 = arith.constant 1 : i32
    %211 = arith.addi %210, %c1_i32_117 : i32
    %212 = arith.index_cast %211 : i32 to index
    %213 = memref.load %arg2[%212] : memref<32xi32, #tpu.memory_space<smem>>
    %214 = arith.index_cast %213 : i32 to index
    %c0_118 = arith.constant 0 : index
    %215 = vector.load %arg5[%214, %c0_118] : memref<16x128xf32, #tpu.memory_space<vmem>>, vector<1x128xf32>
    %c4_i32_119 = arith.constant 4 : i32
    %216 = arith.muli %199, %c4_i32_119 : i32
    %c2_i32_120 = arith.constant 2 : i32
    %217 = arith.addi %216, %c2_i32_120 : i32
    %218 = arith.index_cast %217 : i32 to index
    %219 = memref.load %arg2[%218] : memref<32xi32, #tpu.memory_space<smem>>
    %220 = arith.index_cast %219 : i32 to index
    %c0_121 = arith.constant 0 : index
    %221 = vector.load %arg5[%220, %c0_121] : memref<16x128xf32, #tpu.memory_space<vmem>>, vector<1x128xf32>
    %c4_i32_122 = arith.constant 4 : i32
    %222 = arith.muli %199, %c4_i32_122 : i32
    %c3_i32_123 = arith.constant 3 : i32
    %223 = arith.addi %222, %c3_i32_123 : i32
    %224 = arith.index_cast %223 : i32 to index
    %225 = memref.load %arg2[%224] : memref<32xi32, #tpu.memory_space<smem>>
    %226 = arith.index_cast %225 : i32 to index
    %c0_124 = arith.constant 0 : index
    %227 = vector.load %arg5[%226, %c0_124] : memref<16x128xf32, #tpu.memory_space<vmem>>, vector<1x128xf32>
    %228 = arith.addf %203, %209 : vector<1x128xf32>
    %229 = arith.addf %215, %221 : vector<1x128xf32>
    %230 = arith.addf %228, %229 : vector<1x128xf32>
    %231 = arith.addf %230, %227 : vector<1x128xf32>
    %c3_125 = arith.constant 3 : index
    %c0_126 = arith.constant 0 : index
    %232 = vector.load %arg8[%c3_125, %c0_126] : memref<8x128xf32, #tpu.memory_space<vmem>>, vector<1x128xf32>
    tpu.vector_store %arg8[%c3_125, %c0_126], %231 {strides = array<i32>} : memref<8x128xf32, #tpu.memory_space<vmem>>, vector<1x128xf32>,
    %c4_i32_127 = arith.constant 4 : i32
    %233 = arith.muli %199, %c4_i32_127 : i32
    %c0_i32_128 = arith.constant 0 : i32
    %234 = arith.addi %233, %c0_i32_128 : i32
    %235 = arith.index_cast %234 : i32 to index
    %236 = memref.load %arg3[%235] : memref<32xi32, #tpu.memory_space<smem>>
    %237 = arith.index_cast %236 : i32 to index
    %c0_129 = arith.constant 0 : index
    %238 = vector.load %arg6[%237, %c0_129] : memref<16x128xf32, #tpu.memory_space<vmem>>, vector<1x128xf32>
    %239 = vector.shape_cast %238 : vector<1x128xf32> to vector<1x1x128xf32>
    %c3_130 = arith.constant 3 : index
    %c0_131 = arith.constant 0 : index
    %c0_132 = arith.constant 0 : index
    %240 = vector.load %arg9[%c3_130, %c0_131, %c0_132] : memref<8x4x128xf32, #tpu.memory_space<vmem>>, vector<1x1x128xf32>
    tpu.vector_store %arg9[%c3_130, %c0_131, %c0_132], %239 {strides = array<i32>} : memref<8x4x128xf32, #tpu.memory_space<vmem>>, vector<1x1x128xf32>,
    %c4_i32_133 = arith.constant 4 : i32
    %241 = arith.muli %199, %c4_i32_133 : i32
    %c1_i32_134 = arith.constant 1 : i32
    %242 = arith.addi %241, %c1_i32_134 : i32
    %243 = arith.index_cast %242 : i32 to index
    %244 = memref.load %arg3[%243] : memref<32xi32, #tpu.memory_space<smem>>
    %245 = arith.index_cast %244 : i32 to index
    %c0_135 = arith.constant 0 : index
    %246 = vector.load %arg6[%245, %c0_135] : memref<16x128xf32, #tpu.memory_space<vmem>>, vector<1x128xf32>
    %247 = vector.shape_cast %246 : vector<1x128xf32> to vector<1x1x128xf32>
    %c3_136 = arith.constant 3 : index
    %c1_137 = arith.constant 1 : index
    %c0_138 = arith.constant 0 : index
    %248 = vector.load %arg9[%c3_136, %c1_137, %c0_138] : memref<8x4x128xf32, #tpu.memory_space<vmem>>, vector<1x1x128xf32>
    tpu.vector_store %arg9[%c3_136, %c1_137, %c0_138], %247 {strides = array<i32>} : memref<8x4x128xf32, #tpu.memory_space<vmem>>, vector<1x1x128xf32>,
    %c4_i32_139 = arith.constant 4 : i32
    %249 = arith.muli %199, %c4_i32_139 : i32
    %c2_i32_140 = arith.constant 2 : i32
    %250 = arith.addi %249, %c2_i32_140 : i32
    %251 = arith.index_cast %250 : i32 to index
    %252 = memref.load %arg3[%251] : memref<32xi32, #tpu.memory_space<smem>>
    %253 = arith.index_cast %252 : i32 to index
    %c0_141 = arith.constant 0 : index
    %254 = vector.load %arg6[%253, %c0_141] : memref<16x128xf32, #tpu.memory_space<vmem>>, vector<1x128xf32>
    %255 = vector.shape_cast %254 : vector<1x128xf32> to vector<1x1x128xf32>
    %c3_142 = arith.constant 3 : index
    %c2_143 = arith.constant 2 : index
    %c0_144 = arith.constant 0 : index
    %256 = vector.load %arg9[%c3_142, %c2_143, %c0_144] : memref<8x4x128xf32, #tpu.memory_space<vmem>>, vector<1x1x128xf32>
    tpu.vector_store %arg9[%c3_142, %c2_143, %c0_144], %255 {strides = array<i32>} : memref<8x4x128xf32, #tpu.memory_space<vmem>>, vector<1x1x128xf32>,
    %c4_i32_145 = arith.constant 4 : i32
    %257 = arith.muli %199, %c4_i32_145 : i32
    %c3_i32_146 = arith.constant 3 : i32
    %258 = arith.addi %257, %c3_i32_146 : i32
    %259 = arith.index_cast %258 : i32 to index
    %260 = memref.load %arg3[%259] : memref<32xi32, #tpu.memory_space<smem>>
    %261 = arith.index_cast %260 : i32 to index
    %c0_147 = arith.constant 0 : index
    %262 = vector.load %arg6[%261, %c0_147] : memref<16x128xf32, #tpu.memory_space<vmem>>, vector<1x128xf32>
    %263 = vector.shape_cast %262 : vector<1x128xf32> to vector<1x1x128xf32>
    %c3_148 = arith.constant 3 : index
    %c3_149 = arith.constant 3 : index
    %c0_150 = arith.constant 0 : index
    %264 = vector.load %arg9[%c3_148, %c3_149, %c0_150] : memref<8x4x128xf32, #tpu.memory_space<vmem>>, vector<1x1x128xf32>
    tpu.vector_store %arg9[%c3_148, %c3_149, %c0_150], %263 {strides = array<i32>} : memref<8x4x128xf32, #tpu.memory_space<vmem>>, vector<1x1x128xf32>,
    %c4_i32_151 = arith.constant 4 : i32
    %265 = arith.addi %0, %c4_i32_151 : i32
    %266 = arith.index_cast %265 : i32 to index
    %267 = memref.load %arg1[%266] : memref<8xi32, #tpu.memory_space<smem>>
    %268 = arith.index_cast %267 : i32 to index
    %c0_152 = arith.constant 0 : index
    %269 = vector.load %arg4[%268, %c0_152] : memref<8x128xf32, #tpu.memory_space<vmem>>, vector<1x128xf32>
    %c4_i32_153 = arith.constant 4 : i32
    %270 = arith.muli %265, %c4_i32_153 : i32
    %c0_i32_154 = arith.constant 0 : i32
    %271 = arith.addi %270, %c0_i32_154 : i32
    %272 = arith.index_cast %271 : i32 to index
    %273 = memref.load %arg2[%272] : memref<32xi32, #tpu.memory_space<smem>>
    %274 = arith.index_cast %273 : i32 to index
    %c0_155 = arith.constant 0 : index
    %275 = vector.load %arg5[%274, %c0_155] : memref<16x128xf32, #tpu.memory_space<vmem>>, vector<1x128xf32>
    %c4_i32_156 = arith.constant 4 : i32
    %276 = arith.muli %265, %c4_i32_156 : i32
    %c1_i32_157 = arith.constant 1 : i32
    %277 = arith.addi %276, %c1_i32_157 : i32
    %278 = arith.index_cast %277 : i32 to index
    %279 = memref.load %arg2[%278] : memref<32xi32, #tpu.memory_space<smem>>
    %280 = arith.index_cast %279 : i32 to index
    %c0_158 = arith.constant 0 : index
    %281 = vector.load %arg5[%280, %c0_158] : memref<16x128xf32, #tpu.memory_space<vmem>>, vector<1x128xf32>
    %c4_i32_159 = arith.constant 4 : i32
    %282 = arith.muli %265, %c4_i32_159 : i32
    %c2_i32_160 = arith.constant 2 : i32
    %283 = arith.addi %282, %c2_i32_160 : i32
    %284 = arith.index_cast %283 : i32 to index
    %285 = memref.load %arg2[%284] : memref<32xi32, #tpu.memory_space<smem>>
    %286 = arith.index_cast %285 : i32 to index
    %c0_161 = arith.constant 0 : index
    %287 = vector.load %arg5[%286, %c0_161] : memref<16x128xf32, #tpu.memory_space<vmem>>, vector<1x128xf32>
    %c4_i32_162 = arith.constant 4 : i32
    %288 = arith.muli %265, %c4_i32_162 : i32
    %c3_i32_163 = arith.constant 3 : i32
    %289 = arith.addi %288, %c3_i32_163 : i32
    %290 = arith.index_cast %289 : i32 to index
    %291 = memref.load %arg2[%290] : memref<32xi32, #tpu.memory_space<smem>>
    %292 = arith.index_cast %291 : i32 to index
    %c0_164 = arith.constant 0 : index
    %293 = vector.load %arg5[%292, %c0_164] : memref<16x128xf32, #tpu.memory_space<vmem>>, vector<1x128xf32>
    %294 = arith.addf %269, %275 : vector<1x128xf32>
    %295 = arith.addf %281, %287 : vector<1x128xf32>
    %296 = arith.addf %294, %295 : vector<1x128xf32>
    %297 = arith.addf %296, %293 : vector<1x128xf32>
    %c4 = arith.constant 4 : index
    %c0_165 = arith.constant 0 : index
    %298 = vector.load %arg8[%c4, %c0_165] : memref<8x128xf32, #tpu.memory_space<vmem>>, vector<1x128xf32>
    tpu.vector_store %arg8[%c4, %c0_165], %297 {strides = array<i32>} : memref<8x128xf32, #tpu.memory_space<vmem>>, vector<1x128xf32>,
    %c4_i32_166 = arith.constant 4 : i32
    %299 = arith.muli %265, %c4_i32_166 : i32
    %c0_i32_167 = arith.constant 0 : i32
    %300 = arith.addi %299, %c0_i32_167 : i32
    %301 = arith.index_cast %300 : i32 to index
    %302 = memref.load %arg3[%301] : memref<32xi32, #tpu.memory_space<smem>>
    %303 = arith.index_cast %302 : i32 to index
    %c0_168 = arith.constant 0 : index
    %304 = vector.load %arg6[%303, %c0_168] : memref<16x128xf32, #tpu.memory_space<vmem>>, vector<1x128xf32>
    %305 = vector.shape_cast %304 : vector<1x128xf32> to vector<1x1x128xf32>
    %c4_169 = arith.constant 4 : index
    %c0_170 = arith.constant 0 : index
    %c0_171 = arith.constant 0 : index
    %306 = vector.load %arg9[%c4_169, %c0_170, %c0_171] : memref<8x4x128xf32, #tpu.memory_space<vmem>>, vector<1x1x128xf32>
    tpu.vector_store %arg9[%c4_169, %c0_170, %c0_171], %305 {strides = array<i32>} : memref<8x4x128xf32, #tpu.memory_space<vmem>>, vector<1x1x128xf32>,
    %c4_i32_172 = arith.constant 4 : i32
    %307 = arith.muli %265, %c4_i32_172 : i32
    %c1_i32_173 = arith.constant 1 : i32
    %308 = arith.addi %307, %c1_i32_173 : i32
    %309 = arith.index_cast %308 : i32 to index
    %310 = memref.load %arg3[%309] : memref<32xi32, #tpu.memory_space<smem>>
    %311 = arith.index_cast %310 : i32 to index
    %c0_174 = arith.constant 0 : index
    %312 = vector.load %arg6[%311, %c0_174] : memref<16x128xf32, #tpu.memory_space<vmem>>, vector<1x128xf32>
    %313 = vector.shape_cast %312 : vector<1x128xf32> to vector<1x1x128xf32>
    %c4_175 = arith.constant 4 : index
    %c1_176 = arith.constant 1 : index
    %c0_177 = arith.constant 0 : index
    %314 = vector.load %arg9[%c4_175, %c1_176, %c0_177] : memref<8x4x128xf32, #tpu.memory_space<vmem>>, vector<1x1x128xf32>
    tpu.vector_store %arg9[%c4_175, %c1_176, %c0_177], %313 {strides = array<i32>} : memref<8x4x128xf32, #tpu.memory_space<vmem>>, vector<1x1x128xf32>,
    %c4_i32_178 = arith.constant 4 : i32
    %315 = arith.muli %265, %c4_i32_178 : i32
    %c2_i32_179 = arith.constant 2 : i32
    %316 = arith.addi %315, %c2_i32_179 : i32
    %317 = arith.index_cast %316 : i32 to index
    %318 = memref.load %arg3[%317] : memref<32xi32, #tpu.memory_space<smem>>
    %319 = arith.index_cast %318 : i32 to index
    %c0_180 = arith.constant 0 : index
    %320 = vector.load %arg6[%319, %c0_180] : memref<16x128xf32, #tpu.memory_space<vmem>>, vector<1x128xf32>
    %321 = vector.shape_cast %320 : vector<1x128xf32> to vector<1x1x128xf32>
    %c4_181 = arith.constant 4 : index
    %c2_182 = arith.constant 2 : index
    %c0_183 = arith.constant 0 : index
    %322 = vector.load %arg9[%c4_181, %c2_182, %c0_183] : memref<8x4x128xf32, #tpu.memory_space<vmem>>, vector<1x1x128xf32>
    tpu.vector_store %arg9[%c4_181, %c2_182, %c0_183], %321 {strides = array<i32>} : memref<8x4x128xf32, #tpu.memory_space<vmem>>, vector<1x1x128xf32>,
    %c4_i32_184 = arith.constant 4 : i32
    %323 = arith.muli %265, %c4_i32_184 : i32
    %c3_i32_185 = arith.constant 3 : i32
    %324 = arith.addi %323, %c3_i32_185 : i32
    %325 = arith.index_cast %324 : i32 to index
    %326 = memref.load %arg3[%325] : memref<32xi32, #tpu.memory_space<smem>>
    %327 = arith.index_cast %326 : i32 to index
    %c0_186 = arith.constant 0 : index
    %328 = vector.load %arg6[%327, %c0_186] : memref<16x128xf32, #tpu.memory_space<vmem>>, vector<1x128xf32>
    %329 = vector.shape_cast %328 : vector<1x128xf32> to vector<1x1x128xf32>
    %c4_187 = arith.constant 4 : index
    %c3_188 = arith.constant 3 : index
    %c0_189 = arith.constant 0 : index
    %330 = vector.load %arg9[%c4_187, %c3_188, %c0_189] : memref<8x4x128xf32, #tpu.memory_space<vmem>>, vector<1x1x128xf32>
    tpu.vector_store %arg9[%c4_187, %c3_188, %c0_189], %329 {strides = array<i32>} : memref<8x4x128xf32, #tpu.memory_space<vmem>>, vector<1x1x128xf32>,
    %c5_i32 = arith.constant 5 : i32
    %331 = arith.addi %0, %c5_i32 : i32
    %332 = arith.index_cast %331 : i32 to index
    %333 = memref.load %arg1[%332] : memref<8xi32, #tpu.memory_space<smem>>
    %334 = arith.index_cast %333 : i32 to index
    %c0_190 = arith.constant 0 : index
    %335 = vector.load %arg4[%334, %c0_190] : memref<8x128xf32, #tpu.memory_space<vmem>>, vector<1x128xf32>
    %c4_i32_191 = arith.constant 4 : i32
    %336 = arith.muli %331, %c4_i32_191 : i32
    %c0_i32_192 = arith.constant 0 : i32
    %337 = arith.addi %336, %c0_i32_192 : i32
    %338 = arith.index_cast %337 : i32 to index
    %339 = memref.load %arg2[%338] : memref<32xi32, #tpu.memory_space<smem>>
    %340 = arith.index_cast %339 : i32 to index
    %c0_193 = arith.constant 0 : index
    %341 = vector.load %arg5[%340, %c0_193] : memref<16x128xf32, #tpu.memory_space<vmem>>, vector<1x128xf32>
    %c4_i32_194 = arith.constant 4 : i32
    %342 = arith.muli %331, %c4_i32_194 : i32
    %c1_i32_195 = arith.constant 1 : i32
    %343 = arith.addi %342, %c1_i32_195 : i32
    %344 = arith.index_cast %343 : i32 to index
    %345 = memref.load %arg2[%344] : memref<32xi32, #tpu.memory_space<smem>>
    %346 = arith.index_cast %345 : i32 to index
    %c0_196 = arith.constant 0 : index
    %347 = vector.load %arg5[%346, %c0_196] : memref<16x128xf32, #tpu.memory_space<vmem>>, vector<1x128xf32>
    %c4_i32_197 = arith.constant 4 : i32
    %348 = arith.muli %331, %c4_i32_197 : i32
    %c2_i32_198 = arith.constant 2 : i32
    %349 = arith.addi %348, %c2_i32_198 : i32
    %350 = arith.index_cast %349 : i32 to index
    %351 = memref.load %arg2[%350] : memref<32xi32, #tpu.memory_space<smem>>
    %352 = arith.index_cast %351 : i32 to index
    %c0_199 = arith.constant 0 : index
    %353 = vector.load %arg5[%352, %c0_199] : memref<16x128xf32, #tpu.memory_space<vmem>>, vector<1x128xf32>
    %c4_i32_200 = arith.constant 4 : i32
    %354 = arith.muli %331, %c4_i32_200 : i32
    %c3_i32_201 = arith.constant 3 : i32
    %355 = arith.addi %354, %c3_i32_201 : i32
    %356 = arith.index_cast %355 : i32 to index
    %357 = memref.load %arg2[%356] : memref<32xi32, #tpu.memory_space<smem>>
    %358 = arith.index_cast %357 : i32 to index
    %c0_202 = arith.constant 0 : index
    %359 = vector.load %arg5[%358, %c0_202] : memref<16x128xf32, #tpu.memory_space<vmem>>, vector<1x128xf32>
    %360 = arith.addf %335, %341 : vector<1x128xf32>
    %361 = arith.addf %347, %353 : vector<1x128xf32>
    %362 = arith.addf %360, %361 : vector<1x128xf32>
    %363 = arith.addf %362, %359 : vector<1x128xf32>
    %c5 = arith.constant 5 : index
    %c0_203 = arith.constant 0 : index
    %364 = vector.load %arg8[%c5, %c0_203] : memref<8x128xf32, #tpu.memory_space<vmem>>, vector<1x128xf32>
    tpu.vector_store %arg8[%c5, %c0_203], %363 {strides = array<i32>} : memref<8x128xf32, #tpu.memory_space<vmem>>, vector<1x128xf32>,
    %c4_i32_204 = arith.constant 4 : i32
    %365 = arith.muli %331, %c4_i32_204 : i32
    %c0_i32_205 = arith.constant 0 : i32
    %366 = arith.addi %365, %c0_i32_205 : i32
    %367 = arith.index_cast %366 : i32 to index
    %368 = memref.load %arg3[%367] : memref<32xi32, #tpu.memory_space<smem>>
    %369 = arith.index_cast %368 : i32 to index
    %c0_206 = arith.constant 0 : index
    %370 = vector.load %arg6[%369, %c0_206] : memref<16x128xf32, #tpu.memory_space<vmem>>, vector<1x128xf32>
    %371 = vector.shape_cast %370 : vector<1x128xf32> to vector<1x1x128xf32>
    %c5_207 = arith.constant 5 : index
    %c0_208 = arith.constant 0 : index
    %c0_209 = arith.constant 0 : index
    %372 = vector.load %arg9[%c5_207, %c0_208, %c0_209] : memref<8x4x128xf32, #tpu.memory_space<vmem>>, vector<1x1x128xf32>
    tpu.vector_store %arg9[%c5_207, %c0_208, %c0_209], %371 {strides = array<i32>} : memref<8x4x128xf32, #tpu.memory_space<vmem>>, vector<1x1x128xf32>,
    %c4_i32_210 = arith.constant 4 : i32
    %373 = arith.muli %331, %c4_i32_210 : i32
    %c1_i32_211 = arith.constant 1 : i32
    %374 = arith.addi %373, %c1_i32_211 : i32
    %375 = arith.index_cast %374 : i32 to index
    %376 = memref.load %arg3[%375] : memref<32xi32, #tpu.memory_space<smem>>
    %377 = arith.index_cast %376 : i32 to index
    %c0_212 = arith.constant 0 : index
    %378 = vector.load %arg6[%377, %c0_212] : memref<16x128xf32, #tpu.memory_space<vmem>>, vector<1x128xf32>
    %379 = vector.shape_cast %378 : vector<1x128xf32> to vector<1x1x128xf32>
    %c5_213 = arith.constant 5 : index
    %c1_214 = arith.constant 1 : index
    %c0_215 = arith.constant 0 : index
    %380 = vector.load %arg9[%c5_213, %c1_214, %c0_215] : memref<8x4x128xf32, #tpu.memory_space<vmem>>, vector<1x1x128xf32>
    tpu.vector_store %arg9[%c5_213, %c1_214, %c0_215], %379 {strides = array<i32>} : memref<8x4x128xf32, #tpu.memory_space<vmem>>, vector<1x1x128xf32>,
    %c4_i32_216 = arith.constant 4 : i32
    %381 = arith.muli %331, %c4_i32_216 : i32
    %c2_i32_217 = arith.constant 2 : i32
    %382 = arith.addi %381, %c2_i32_217 : i32
    %383 = arith.index_cast %382 : i32 to index
    %384 = memref.load %arg3[%383] : memref<32xi32, #tpu.memory_space<smem>>
    %385 = arith.index_cast %384 : i32 to index
    %c0_218 = arith.constant 0 : index
    %386 = vector.load %arg6[%385, %c0_218] : memref<16x128xf32, #tpu.memory_space<vmem>>, vector<1x128xf32>
    %387 = vector.shape_cast %386 : vector<1x128xf32> to vector<1x1x128xf32>
    %c5_219 = arith.constant 5 : index
    %c2_220 = arith.constant 2 : index
    %c0_221 = arith.constant 0 : index
    %388 = vector.load %arg9[%c5_219, %c2_220, %c0_221] : memref<8x4x128xf32, #tpu.memory_space<vmem>>, vector<1x1x128xf32>
    tpu.vector_store %arg9[%c5_219, %c2_220, %c0_221], %387 {strides = array<i32>} : memref<8x4x128xf32, #tpu.memory_space<vmem>>, vector<1x1x128xf32>,
    %c4_i32_222 = arith.constant 4 : i32
    %389 = arith.muli %331, %c4_i32_222 : i32
    %c3_i32_223 = arith.constant 3 : i32
    %390 = arith.addi %389, %c3_i32_223 : i32
    %391 = arith.index_cast %390 : i32 to index
    %392 = memref.load %arg3[%391] : memref<32xi32, #tpu.memory_space<smem>>
    %393 = arith.index_cast %392 : i32 to index
    %c0_224 = arith.constant 0 : index
    %394 = vector.load %arg6[%393, %c0_224] : memref<16x128xf32, #tpu.memory_space<vmem>>, vector<1x128xf32>
    %395 = vector.shape_cast %394 : vector<1x128xf32> to vector<1x1x128xf32>
    %c5_225 = arith.constant 5 : index
    %c3_226 = arith.constant 3 : index
    %c0_227 = arith.constant 0 : index
    %396 = vector.load %arg9[%c5_225, %c3_226, %c0_227] : memref<8x4x128xf32, #tpu.memory_space<vmem>>, vector<1x1x128xf32>
    tpu.vector_store %arg9[%c5_225, %c3_226, %c0_227], %395 {strides = array<i32>} : memref<8x4x128xf32, #tpu.memory_space<vmem>>, vector<1x1x128xf32>,
    %c6_i32 = arith.constant 6 : i32
    %397 = arith.addi %0, %c6_i32 : i32
    %398 = arith.index_cast %397 : i32 to index
    %399 = memref.load %arg1[%398] : memref<8xi32, #tpu.memory_space<smem>>
    %400 = arith.index_cast %399 : i32 to index
    %c0_228 = arith.constant 0 : index
    %401 = vector.load %arg4[%400, %c0_228] : memref<8x128xf32, #tpu.memory_space<vmem>>, vector<1x128xf32>
    %c4_i32_229 = arith.constant 4 : i32
    %402 = arith.muli %397, %c4_i32_229 : i32
    %c0_i32_230 = arith.constant 0 : i32
    %403 = arith.addi %402, %c0_i32_230 : i32
    %404 = arith.index_cast %403 : i32 to index
    %405 = memref.load %arg2[%404] : memref<32xi32, #tpu.memory_space<smem>>
    %406 = arith.index_cast %405 : i32 to index
    %c0_231 = arith.constant 0 : index
    %407 = vector.load %arg5[%406, %c0_231] : memref<16x128xf32, #tpu.memory_space<vmem>>, vector<1x128xf32>
    %c4_i32_232 = arith.constant 4 : i32
    %408 = arith.muli %397, %c4_i32_232 : i32
    %c1_i32_233 = arith.constant 1 : i32
    %409 = arith.addi %408, %c1_i32_233 : i32
    %410 = arith.index_cast %409 : i32 to index
    %411 = memref.load %arg2[%410] : memref<32xi32, #tpu.memory_space<smem>>
    %412 = arith.index_cast %411 : i32 to index
    %c0_234 = arith.constant 0 : index
    %413 = vector.load %arg5[%412, %c0_234] : memref<16x128xf32, #tpu.memory_space<vmem>>, vector<1x128xf32>
    %c4_i32_235 = arith.constant 4 : i32
    %414 = arith.muli %397, %c4_i32_235 : i32
    %c2_i32_236 = arith.constant 2 : i32
    %415 = arith.addi %414, %c2_i32_236 : i32
    %416 = arith.index_cast %415 : i32 to index
    %417 = memref.load %arg2[%416] : memref<32xi32, #tpu.memory_space<smem>>
    %418 = arith.index_cast %417 : i32 to index
    %c0_237 = arith.constant 0 : index
    %419 = vector.load %arg5[%418, %c0_237] : memref<16x128xf32, #tpu.memory_space<vmem>>, vector<1x128xf32>
    %c4_i32_238 = arith.constant 4 : i32
    %420 = arith.muli %397, %c4_i32_238 : i32
    %c3_i32_239 = arith.constant 3 : i32
    %421 = arith.addi %420, %c3_i32_239 : i32
    %422 = arith.index_cast %421 : i32 to index
    %423 = memref.load %arg2[%422] : memref<32xi32, #tpu.memory_space<smem>>
    %424 = arith.index_cast %423 : i32 to index
    %c0_240 = arith.constant 0 : index
    %425 = vector.load %arg5[%424, %c0_240] : memref<16x128xf32, #tpu.memory_space<vmem>>, vector<1x128xf32>
    %426 = arith.addf %401, %407 : vector<1x128xf32>
    %427 = arith.addf %413, %419 : vector<1x128xf32>
    %428 = arith.addf %426, %427 : vector<1x128xf32>
    %429 = arith.addf %428, %425 : vector<1x128xf32>
    %c6 = arith.constant 6 : index
    %c0_241 = arith.constant 0 : index
    %430 = vector.load %arg8[%c6, %c0_241] : memref<8x128xf32, #tpu.memory_space<vmem>>, vector<1x128xf32>
    tpu.vector_store %arg8[%c6, %c0_241], %429 {strides = array<i32>} : memref<8x128xf32, #tpu.memory_space<vmem>>, vector<1x128xf32>,
    %c4_i32_242 = arith.constant 4 : i32
    %431 = arith.muli %397, %c4_i32_242 : i32
    %c0_i32_243 = arith.constant 0 : i32
    %432 = arith.addi %431, %c0_i32_243 : i32
    %433 = arith.index_cast %432 : i32 to index
    %434 = memref.load %arg3[%433] : memref<32xi32, #tpu.memory_space<smem>>
    %435 = arith.index_cast %434 : i32 to index
    %c0_244 = arith.constant 0 : index
    %436 = vector.load %arg6[%435, %c0_244] : memref<16x128xf32, #tpu.memory_space<vmem>>, vector<1x128xf32>
    %437 = vector.shape_cast %436 : vector<1x128xf32> to vector<1x1x128xf32>
    %c6_245 = arith.constant 6 : index
    %c0_246 = arith.constant 0 : index
    %c0_247 = arith.constant 0 : index
    %438 = vector.load %arg9[%c6_245, %c0_246, %c0_247] : memref<8x4x128xf32, #tpu.memory_space<vmem>>, vector<1x1x128xf32>
    tpu.vector_store %arg9[%c6_245, %c0_246, %c0_247], %437 {strides = array<i32>} : memref<8x4x128xf32, #tpu.memory_space<vmem>>, vector<1x1x128xf32>,
    %c4_i32_248 = arith.constant 4 : i32
    %439 = arith.muli %397, %c4_i32_248 : i32
    %c1_i32_249 = arith.constant 1 : i32
    %440 = arith.addi %439, %c1_i32_249 : i32
    %441 = arith.index_cast %440 : i32 to index
    %442 = memref.load %arg3[%441] : memref<32xi32, #tpu.memory_space<smem>>
    %443 = arith.index_cast %442 : i32 to index
    %c0_250 = arith.constant 0 : index
    %444 = vector.load %arg6[%443, %c0_250] : memref<16x128xf32, #tpu.memory_space<vmem>>, vector<1x128xf32>
    %445 = vector.shape_cast %444 : vector<1x128xf32> to vector<1x1x128xf32>
    %c6_251 = arith.constant 6 : index
    %c1_252 = arith.constant 1 : index
    %c0_253 = arith.constant 0 : index
    %446 = vector.load %arg9[%c6_251, %c1_252, %c0_253] : memref<8x4x128xf32, #tpu.memory_space<vmem>>, vector<1x1x128xf32>
    tpu.vector_store %arg9[%c6_251, %c1_252, %c0_253], %445 {strides = array<i32>} : memref<8x4x128xf32, #tpu.memory_space<vmem>>, vector<1x1x128xf32>,
    %c4_i32_254 = arith.constant 4 : i32
    %447 = arith.muli %397, %c4_i32_254 : i32
    %c2_i32_255 = arith.constant 2 : i32
    %448 = arith.addi %447, %c2_i32_255 : i32
    %449 = arith.index_cast %448 : i32 to index
    %450 = memref.load %arg3[%449] : memref<32xi32, #tpu.memory_space<smem>>
    %451 = arith.index_cast %450 : i32 to index
    %c0_256 = arith.constant 0 : index
    %452 = vector.load %arg6[%451, %c0_256] : memref<16x128xf32, #tpu.memory_space<vmem>>, vector<1x128xf32>
    %453 = vector.shape_cast %452 : vector<1x128xf32> to vector<1x1x128xf32>
    %c6_257 = arith.constant 6 : index
    %c2_258 = arith.constant 2 : index
    %c0_259 = arith.constant 0 : index
    %454 = vector.load %arg9[%c6_257, %c2_258, %c0_259] : memref<8x4x128xf32, #tpu.memory_space<vmem>>, vector<1x1x128xf32>
    tpu.vector_store %arg9[%c6_257, %c2_258, %c0_259], %453 {strides = array<i32>} : memref<8x4x128xf32, #tpu.memory_space<vmem>>, vector<1x1x128xf32>,
    %c4_i32_260 = arith.constant 4 : i32
    %455 = arith.muli %397, %c4_i32_260 : i32
    %c3_i32_261 = arith.constant 3 : i32
    %456 = arith.addi %455, %c3_i32_261 : i32
    %457 = arith.index_cast %456 : i32 to index
    %458 = memref.load %arg3[%457] : memref<32xi32, #tpu.memory_space<smem>>
    %459 = arith.index_cast %458 : i32 to index
    %c0_262 = arith.constant 0 : index
    %460 = vector.load %arg6[%459, %c0_262] : memref<16x128xf32, #tpu.memory_space<vmem>>, vector<1x128xf32>
    %461 = vector.shape_cast %460 : vector<1x128xf32> to vector<1x1x128xf32>
    %c6_263 = arith.constant 6 : index
    %c3_264 = arith.constant 3 : index
    %c0_265 = arith.constant 0 : index
    %462 = vector.load %arg9[%c6_263, %c3_264, %c0_265] : memref<8x4x128xf32, #tpu.memory_space<vmem>>, vector<1x1x128xf32>
    tpu.vector_store %arg9[%c6_263, %c3_264, %c0_265], %461 {strides = array<i32>} : memref<8x4x128xf32, #tpu.memory_space<vmem>>, vector<1x1x128xf32>,
    %c7_i32 = arith.constant 7 : i32
    %463 = arith.addi %0, %c7_i32 : i32
    %464 = arith.index_cast %463 : i32 to index
    %465 = memref.load %arg1[%464] : memref<8xi32, #tpu.memory_space<smem>>
    %466 = arith.index_cast %465 : i32 to index
    %c0_266 = arith.constant 0 : index
    %467 = vector.load %arg4[%466, %c0_266] : memref<8x128xf32, #tpu.memory_space<vmem>>, vector<1x128xf32>
    %c4_i32_267 = arith.constant 4 : i32
    %468 = arith.muli %463, %c4_i32_267 : i32
    %c0_i32_268 = arith.constant 0 : i32
    %469 = arith.addi %468, %c0_i32_268 : i32
    %470 = arith.index_cast %469 : i32 to index
    %471 = memref.load %arg2[%470] : memref<32xi32, #tpu.memory_space<smem>>
    %472 = arith.index_cast %471 : i32 to index
    %c0_269 = arith.constant 0 : index
    %473 = vector.load %arg5[%472, %c0_269] : memref<16x128xf32, #tpu.memory_space<vmem>>, vector<1x128xf32>
    %c4_i32_270 = arith.constant 4 : i32
    %474 = arith.muli %463, %c4_i32_270 : i32
    %c1_i32_271 = arith.constant 1 : i32
    %475 = arith.addi %474, %c1_i32_271 : i32
    %476 = arith.index_cast %475 : i32 to index
    %477 = memref.load %arg2[%476] : memref<32xi32, #tpu.memory_space<smem>>
    %478 = arith.index_cast %477 : i32 to index
    %c0_272 = arith.constant 0 : index
    %479 = vector.load %arg5[%478, %c0_272] : memref<16x128xf32, #tpu.memory_space<vmem>>, vector<1x128xf32>
    %c4_i32_273 = arith.constant 4 : i32
    %480 = arith.muli %463, %c4_i32_273 : i32
    %c2_i32_274 = arith.constant 2 : i32
    %481 = arith.addi %480, %c2_i32_274 : i32
    %482 = arith.index_cast %481 : i32 to index
    %483 = memref.load %arg2[%482] : memref<32xi32, #tpu.memory_space<smem>>
    %484 = arith.index_cast %483 : i32 to index
    %c0_275 = arith.constant 0 : index
    %485 = vector.load %arg5[%484, %c0_275] : memref<16x128xf32, #tpu.memory_space<vmem>>, vector<1x128xf32>
    %c4_i32_276 = arith.constant 4 : i32
    %486 = arith.muli %463, %c4_i32_276 : i32
    %c3_i32_277 = arith.constant 3 : i32
    %487 = arith.addi %486, %c3_i32_277 : i32
    %488 = arith.index_cast %487 : i32 to index
    %489 = memref.load %arg2[%488] : memref<32xi32, #tpu.memory_space<smem>>
    %490 = arith.index_cast %489 : i32 to index
    %c0_278 = arith.constant 0 : index
    %491 = vector.load %arg5[%490, %c0_278] : memref<16x128xf32, #tpu.memory_space<vmem>>, vector<1x128xf32>
    %492 = arith.addf %467, %473 : vector<1x128xf32>
    %493 = arith.addf %479, %485 : vector<1x128xf32>
    %494 = arith.addf %492, %493 : vector<1x128xf32>
    %495 = arith.addf %494, %491 : vector<1x128xf32>
    %c7 = arith.constant 7 : index
    %c0_279 = arith.constant 0 : index
    %496 = vector.load %arg8[%c7, %c0_279] : memref<8x128xf32, #tpu.memory_space<vmem>>, vector<1x128xf32>
    tpu.vector_store %arg8[%c7, %c0_279], %495 {strides = array<i32>} : memref<8x128xf32, #tpu.memory_space<vmem>>, vector<1x128xf32>,
    %c4_i32_280 = arith.constant 4 : i32
    %497 = arith.muli %463, %c4_i32_280 : i32
    %c0_i32_281 = arith.constant 0 : i32
    %498 = arith.addi %497, %c0_i32_281 : i32
    %499 = arith.index_cast %498 : i32 to index
    %500 = memref.load %arg3[%499] : memref<32xi32, #tpu.memory_space<smem>>
    %501 = arith.index_cast %500 : i32 to index
    %c0_282 = arith.constant 0 : index
    %502 = vector.load %arg6[%501, %c0_282] : memref<16x128xf32, #tpu.memory_space<vmem>>, vector<1x128xf32>
    %503 = vector.shape_cast %502 : vector<1x128xf32> to vector<1x1x128xf32>
    %c7_283 = arith.constant 7 : index
    %c0_284 = arith.constant 0 : index
    %c0_285 = arith.constant 0 : index
    %504 = vector.load %arg9[%c7_283, %c0_284, %c0_285] : memref<8x4x128xf32, #tpu.memory_space<vmem>>, vector<1x1x128xf32>
    tpu.vector_store %arg9[%c7_283, %c0_284, %c0_285], %503 {strides = array<i32>} : memref<8x4x128xf32, #tpu.memory_space<vmem>>, vector<1x1x128xf32>,
    %c4_i32_286 = arith.constant 4 : i32
    %505 = arith.muli %463, %c4_i32_286 : i32
    %c1_i32_287 = arith.constant 1 : i32
    %506 = arith.addi %505, %c1_i32_287 : i32
    %507 = arith.index_cast %506 : i32 to index
    %508 = memref.load %arg3[%507] : memref<32xi32, #tpu.memory_space<smem>>
    %509 = arith.index_cast %508 : i32 to index
    %c0_288 = arith.constant 0 : index
    %510 = vector.load %arg6[%509, %c0_288] : memref<16x128xf32, #tpu.memory_space<vmem>>, vector<1x128xf32>
    %511 = vector.shape_cast %510 : vector<1x128xf32> to vector<1x1x128xf32>
    %c7_289 = arith.constant 7 : index
    %c1_290 = arith.constant 1 : index
    %c0_291 = arith.constant 0 : index
    %512 = vector.load %arg9[%c7_289, %c1_290, %c0_291] : memref<8x4x128xf32, #tpu.memory_space<vmem>>, vector<1x1x128xf32>
    tpu.vector_store %arg9[%c7_289, %c1_290, %c0_291], %511 {strides = array<i32>} : memref<8x4x128xf32, #tpu.memory_space<vmem>>, vector<1x1x128xf32>,
    %c4_i32_292 = arith.constant 4 : i32
    %513 = arith.muli %463, %c4_i32_292 : i32
    %c2_i32_293 = arith.constant 2 : i32
    %514 = arith.addi %513, %c2_i32_293 : i32
    %515 = arith.index_cast %514 : i32 to index
    %516 = memref.load %arg3[%515] : memref<32xi32, #tpu.memory_space<smem>>
    %517 = arith.index_cast %516 : i32 to index
    %c0_294 = arith.constant 0 : index
    %518 = vector.load %arg6[%517, %c0_294] : memref<16x128xf32, #tpu.memory_space<vmem>>, vector<1x128xf32>
    %519 = vector.shape_cast %518 : vector<1x128xf32> to vector<1x1x128xf32>
    %c7_295 = arith.constant 7 : index
    %c2_296 = arith.constant 2 : index
    %c0_297 = arith.constant 0 : index
    %520 = vector.load %arg9[%c7_295, %c2_296, %c0_297] : memref<8x4x128xf32, #tpu.memory_space<vmem>>, vector<1x1x128xf32>
    tpu.vector_store %arg9[%c7_295, %c2_296, %c0_297], %519 {strides = array<i32>} : memref<8x4x128xf32, #tpu.memory_space<vmem>>, vector<1x1x128xf32>,
    %c4_i32_298 = arith.constant 4 : i32
    %521 = arith.muli %463, %c4_i32_298 : i32
    %c3_i32_299 = arith.constant 3 : i32
    %522 = arith.addi %521, %c3_i32_299 : i32
    %523 = arith.index_cast %522 : i32 to index
    %524 = memref.load %arg3[%523] : memref<32xi32, #tpu.memory_space<smem>>
    %525 = arith.index_cast %524 : i32 to index
    %c0_300 = arith.constant 0 : index
    %526 = vector.load %arg6[%525, %c0_300] : memref<16x128xf32, #tpu.memory_space<vmem>>, vector<1x128xf32>
    %527 = vector.shape_cast %526 : vector<1x128xf32> to vector<1x1x128xf32>
    %c7_301 = arith.constant 7 : index
    %c3_302 = arith.constant 3 : index
    %c0_303 = arith.constant 0 : index
    %528 = vector.load %arg9[%c7_301, %c3_302, %c0_303] : memref<8x4x128xf32, #tpu.memory_space<vmem>>, vector<1x1x128xf32>
    tpu.vector_store %arg9[%c7_301, %c3_302, %c0_303], %527 {strides = array<i32>} : memref<8x4x128xf32, #tpu.memory_space<vmem>>, vector<1x1x128xf32>,
    %c0_304 = arith.constant 0 : index
    %c0_305 = arith.constant 0 : index
    %529 = vector.load %arg8[%c0_304, %c0_305] : memref<8x128xf32, #tpu.memory_space<vmem>>, vector<8x128xf32>
    %c0_306 = arith.constant 0 : index
    %c0_307 = arith.constant 0 : index
    %c0_308 = arith.constant 0 : index
    %530 = vector.load %arg9[%c0_306, %c0_307, %c0_308] : memref<8x4x128xf32, #tpu.memory_space<vmem>>, vector<8x4x128xf32>
    %531 = vector.shape_cast %529 : vector<8x128xf32> to vector<8x1x128xf32>
    %532 = vector.broadcast %531 : vector<8x1x128xf32> to vector<8x4x128xf32>
    %533 = arith.mulf %530, %532 : vector<8x4x128xf32>
    %cst = arith.constant dense<0.000000e+00> : vector<8x4xf32>
    %534 = vector.multi_reduction <add>, %533, %cst [2] : vector<8x4x128xf32> to vector<8x4xf32>
    %c0_309 = arith.constant 0 : index
    %c0_310 = arith.constant 0 : index
    %535 = vector.load %arg7[%c0_309, %c0_310] : memref<8x4xf32, #tpu.memory_space<vmem>>, vector<8x4xf32>
    tpu.vector_store %arg7[%c0_309, %c0_310], %534 {strides = array<i32>} : memref<8x4xf32, #tpu.memory_space<vmem>>, vector<8x4xf32>,
    return
  }
  func.func @transform_0(%arg0: i32, %arg1: memref<8xi32, #tpu.memory_space<smem>>, %arg2: memref<32xi32, #tpu.memory_space<smem>>, %arg3: memref<32xi32, #tpu.memory_space<smem>>) -> (i32, i32) {
    %c0_i32 = arith.constant 0 : i32
    %c0_i32_0 = arith.constant 0 : i32
    %c0_i32_1 = arith.constant 0 : i32
    return %c0_i32, %c0_i32_0 : i32, i32
  }
  func.func @transform_1(%arg0: i32, %arg1: memref<8xi32, #tpu.memory_space<smem>>, %arg2: memref<32xi32, #tpu.memory_space<smem>>, %arg3: memref<32xi32, #tpu.memory_space<smem>>) -> (i32, i32) {
    %c0_i32 = arith.constant 0 : i32
    %c0_i32_0 = arith.constant 0 : i32
    %c0_i32_1 = arith.constant 0 : i32
    return %c0_i32, %c0_i32_0 : i32, i32
  }
  func.func @transform_2(%arg0: i32, %arg1: memref<8xi32, #tpu.memory_space<smem>>, %arg2: memref<32xi32, #tpu.memory_space<smem>>, %arg3: memref<32xi32, #tpu.memory_space<smem>>) -> (i32, i32) {
    %c0_i32 = arith.constant 0 : i32
    %c0_i32_0 = arith.constant 0 : i32
    %c0_i32_1 = arith.constant 0 : i32
    return %c0_i32, %c0_i32_0 : i32, i32
  }
  func.func @transform_3(%arg0: i32, %arg1: memref<8xi32, #tpu.memory_space<smem>>, %arg2: memref<32xi32, #tpu.memory_space<smem>>, %arg3: memref<32xi32, #tpu.memory_space<smem>>) -> (i32, i32) {
    %c0_i32 = arith.constant 0 : i32
    %c0_i32_0 = arith.constant 0 : i32
    return %arg0, %c0_i32 : i32, i32
  }
}

</mosaic_0001>

<bundles_post_ra>
// kernel: tpu_custom_call.1
= control target key start
LH: loop header
LB: loop body
LE: loop exit
PB: predicated region body
PF: predicated region fallthrough
CT: control target
= control target key end

     0   :  { %s849_s21 = smov [#allocation5]   ;;  %s1029_s0 = inlined_call_operand.hbm [shape: s32[8], index: 0, kind: input, shape index: {}]   ;;  %s1030_s3 = inlined_call_operand.hbm [shape: f32[8,128], index: 3, kind: input, shape index: {}]   ;;  %s1031_s4 = inlined_call_operand.hbm [shape: f32[16,128], index: 4, kind: input, shape index: {}]   ;;  %s1032_s5 = inlined_call_operand.hbm [shape: f32[16,128], index: 5, kind: input, shape index: {}]   ;;  %s1033_s6 = inlined_call_operand.vmem [shape: f32[8,4], index: 6, kind: output, shape index: {}]   ;;  %s1034_s1 = inlined_call_operand.vmem [shape: s32[32], index: 1, kind: input, shape index: {}]   ;;  %s1035_s2 = inlined_call_operand.vmem [shape: s32[32], index: 2, kind: input, shape index: {}]  }
   0x1   :  { %12 = dma.hbm_to_smem %s1029_s0, 16, %s849_s21, [#allocation4] }
   0x2   :  { %s13_s26 = sshll.u32 %s1034_s1, 4  ;;  %s17_s29 = sshll.u32 %s1035_s2, 4  ;;  %s14_s26 = int_to_ptr.vmem [resolvable:$true] %s13_s26  ;;  %s18_s29 = int_to_ptr.vmem [resolvable:$true] %s17_s29 }
   0x3   :  { %s759_s30 = scalar_lea.vmem %s14_s26, 16  ;;  %p764_p1 = scmp.lt.s32.totalorder %s14_s26, %s14_s26 }
   0x4   :  { %p760_p0 = scmp.ne.s32.totalorder %s14_s26, %s759_s30  ;;  %p765_p2 = scmp.lt.s32.totalorder %s759_s30, %s759_s30 }
   0x6   :  { %p766_p3 = por %p765_p2, %p764_p1 }
   0x8   :  { %p767_p4 = pnand %p766_p3, %p760_p0 }
   0xa   :  { %770 = shalt.err (!%p767_p4)  }
   0xb   :  { %s850_s7 = smov [#allocation6]   ;;  %s771_s0 = scalar_lea.vmem %s18_s29, 16 }
   0xc   :  { %16 = dma.vmem_to_smem %s14_s26, 16, %s850_s7, [#allocation4] }
   0xd   :  { %p772_p5 = scmp.ne.s32.totalorder %s18_s29, %s771_s0  ;;  %p776_p6 = scmp.lt.s32.totalorder %s18_s29, %s18_s29 }
   0xe   :  { %p777_p7 = scmp.lt.s32.totalorder %s771_s0, %s771_s0 }
  0x10   :  { %p778_p8 = por %p777_p7, %p776_p6 }
  0x12   :  { %p779_p9 = pnand %p778_p8, %p772_p5 }
  0x14   :  { %782 = shalt.err (!%p779_p9)  }
  0x15   :  { %s851_s1 = smov [#allocation7]  }
  0x16   :  { %20 = dma.vmem_to_smem %s18_s29, 16, %s851_s1, [#allocation4] }
  0x17   :  { %843 = dma.done.wait [#allocation4], 48 }
  0x18   :  { %844 = vsyncadd [#allocation4], 4294967248 }
  0x19   :  { %22 = sfence }
  0x1a   :  { %23 = vsyncpa [#allocation9], 0 }
  0x1b   :  { %24 = vsyncpa [#allocation11], 0  ;;  %s852_s2 = smov [#allocation10]  }
  0x1c   :  { %s40_s8 = sshll.u32 %s852_s2, 4  ;;  %s41_s8 = int_to_ptr.vmem [resolvable:$true] %s40_s8 }
  0x1d   :  { %s791_s9 = scalar_lea.vmem %s41_s8, 256  ;;  %p796_p11 = scmp.lt.s32.totalorder %s41_s8, %s41_s8 }
  0x1e   :  { %p792_p10 = scmp.ne.s32.totalorder %s41_s8, %s791_s9  ;;  %p797_p12 = scmp.lt.s32.totalorder %s791_s9, %s791_s9 }
  0x20   :  { %p798_p13 = por %p797_p12, %p796_p11 }
  0x22   :  { %p799_p0 = pnand %p798_p13, %p792_p10 }
  0x24   :  { %802 = shalt.err (!%p799_p0)
}
  0x25   :  { %s853_s10 = smov 128   ;;  %s854_s11 = smov 8  }
  0x26   :  { %46 = dma.hbm_to_vmem [thread:$0]  %s1031_s4, 256, %s41_s8, [#allocation11], %s853_s10, %s853_s10, %s854_s11  }
  0x27   :  { %s855_s14 = smov [#allocation8]   ;;  %s856_s16 = smov [#allocation12]  }
  0x28   :  { %s31_s15 = sshll.u32 %s855_s14, 4  ;;  %s52_s17 = sshll.u32 %s856_s16, 4  ;;  %s32_s15 = int_to_ptr.vmem [resolvable:$true] %s31_s15  ;;  %s53_s17 = int_to_ptr.vmem [resolvable:$true] %s52_s17 }
  0x29   :  { %s811_s18 = scalar_lea.vmem %s32_s15, 128  ;;  %p816_p2 = scmp.lt.s32.totalorder %s32_s15, %s32_s15 }
  0x2a   :  { %p812_p1 = scmp.ne.s32.totalorder %s32_s15, %s811_s18  ;;  %p817_p3 = scmp.lt.s32.totalorder %s811_s18, %s811_s18 }
  0x2c   :  { %p818_p4 = por %p817_p3, %p816_p2 }
  0x2e   :  { %p819_p5 = pnand %p818_p4, %p812_p1 }
  0x30   :  { %822 = shalt.err (!%p819_p5)
}
  0x31   :  { %34 = dma.hbm_to_vmem [thread:$0]  %s1030_s3, 128, %s32_s15, [#allocation9]  }
  0x32   :  { %s831_s21 = scalar_lea.vmem %s53_s17, 256  ;;  %p836_p7 = scmp.lt.s32.totalorder %s53_s17, %s53_s17 }
  0x33   :  { %p832_p6 = scmp.ne.s32.totalorder %s53_s17, %s831_s21  ;;  %p837_p8 = scmp.lt.s32.totalorder %s831_s21, %s831_s21 }
  0x35   :  { %p838_p9 = por %p837_p8, %p836_p7 }
  0x37   :  { %p839_p10 = pnand %p838_p9, %p832_p6 }
  0x39   :  { %842 = shalt.err (!%p839_p10)
}
  0x3a   :  { %58 = dma.hbm_to_vmem [thread:$0]  %s1032_s5, 256, %s53_s17, [#allocation11], %s853_s10, %s853_s10, %s854_s11  }
  0x3b   :  { %845 = dma.done.wait [#allocation9], 128  }
  0x3c   :  { %846 = vsyncadd [#allocation9], 4294967168 }
  0x3d   :  { %847 = dma.done.wait [#allocation11], 512  }
  0x3e   :  { %848 = vsyncadd [#allocation11], 4294966784  ;;  %v417_v0 = vlaneseq  ;;  %s69_s23 = sld [smem:[#allocation5]]  ;;  %vm510_vm0 = vcmask 1043456   ;;  %vm577_vm1 = vcmask 1041409   ;;  %vm579_vm2 = vcmask 1042434  }
  0x3f   :  { %s73_s24 = sld [smem:[#allocation6]]  ;;  %vm581_vm3 = vcmask 1043459   ;;  %vm583_vm4 = vcmask 1044484   ;;  %vm585_vm5 = vcmask 1045509   ;;  %vm587_vm6 = vcmask 1046534  }
  0x40   :  { %v911_v1 = vshrl.u32 %v417_v0, 7  ;;  %v544_v2 = vand.u32 127, %v417_v0  ;;  %s672_s3 = sld [smem:[#allocation6 + $0x1]]  ;;  %vm589_vm7 = vcmask 1047559   ;;  %vm592_vm8 = vcmask 31744  }
  0x41   :  { %s673_s25 = sld [smem:[#allocation6 + $0x2]] }
  0x42   :  { %v914_v3 = vsub.s32 %v544_v2, %v911_v1  ;;  %s674_s26 = sld [smem:[#allocation6 + $0x3]] }
  0x43   :  { %s93_s27 = sld [smem:[#allocation7]] }
  0x44   :  { %s675_s28 = sld [smem:[#allocation7 + $0x1]]  ;;  %s70_s29 = scalar_lea.vmem [#allocation8], %s69_s23 }
  0x45   :  { %v71_v4 = vld [vmem:[%s70_s29] sm:$0x1]  ;;  %s676_s5 = sld [smem:[#allocation7 + $0x2]]  ;;  %s74_s30 = scalar_lea.vmem [#allocation10], %s73_s24 }
  0x46   :  { %v75_v5 = vld [vmem:[%s74_s30] sm:$0x1]  ;;  %s677_s7 = sld [smem:[#allocation7 + $0x3]]  ;;  %s78_s0 = scalar_lea.vmem [#allocation10], %s672_s3 }
  0x47   :  { %v79_v6 = vld [vmem:[%s78_s0] sm:$0x1]  ;;  %v88_v7 = vadd.f32 %v75_v5, %v71_v4  ;;  %s678_s1 = sld [smem:[#allocation5 + $0x1]]  ;;  %s82_s2 = scalar_lea.vmem [#allocation10], %s673_s25 }
  0x48   :  { %v83_v8 = vld [vmem:[%s82_s2] sm:$0x1]  ;;  %s679_s8 = sld [smem:[#allocation6 + $0x4]]  ;;  %s86_s9 = scalar_lea.vmem [#allocation10], %s674_s26 }
  0x49   :  { %v87_v9 = vld [vmem:[%s86_s9] sm:$0x1]  ;;  %v89_v10 = vadd.f32 %v83_v8, %v79_v6  ;;  %s680_s10 = sld [smem:[#allocation6 + $0x5]]  ;;  %s94_s11 = scalar_lea.vmem [#allocation12], %s93_s27 }
  0x4a   :  { %v95_v11 = vld [vmem:[%s94_s11] sm:$0x1]  ;;  %s681_s12 = sld [smem:[#allocation6 + $0x6]]  ;;  %s98_s13 = scalar_lea.vmem [#allocation12], %s675_s28 }
  0x4b   :  { %v90_v12 = vadd.f32 %v89_v10, %v88_v7  ;;  %96 = vst [vmem:[#allocation3] sm:$0x1] %v95_v11  ;;  %v99_v13 = vld [vmem:[%s98_s13] sm:$0x1]  ;;  %s682_s14 = sld [smem:[#allocation6 + $0x7]]  ;;  %s102_s15 = scalar_lea.vmem [#allocation12], %s676_s5 }
  0x4c   :  { %100 = vst [vmem:[#allocation3 + $0x1] sm:$0x1] %v99_v13  ;;  %v103_v14 = vld [vmem:[%s102_s15] sm:$0x1]  ;;  %s687_s16 = sld [smem:[#allocation5 + $0x2]]  ;;  %s106_s17 = scalar_lea.vmem [#allocation12], %s677_s7 }
  0x4d   :  { %v91_v15 = vadd.f32 %v90_v12, %v87_v9  ;;  %104 = vst [vmem:[#allocation3 + $0x2] sm:$0x1] %v103_v14  ;;  %v107_v16 = vld [vmem:[%s106_s17] sm:$0x1]  ;;  %s688_s18 = sld [smem:[#allocation6 + $0x8]]  ;;  %s111_s19 = scalar_lea.vmem [#allocation8], %s678_s1 }
  0x4e   :  { %108 = vst [vmem:[#allocation3 + $0x3] sm:$0x1] %v107_v16  ;;  %v112_v17 = vld [vmem:[%s111_s19] sm:$0x1]  ;;  %s689_s20 = sld [smem:[#allocation6 + $0x9]]  ;;  %s115_s21 = scalar_lea.vmem [#allocation10], %s679_s8 }
  0x4f   :  { %92 = vst [vmem:[#allocation2] sm:$0x1] %v91_v15  ;;  %v116_v18 = vld [vmem:[%s115_s21] sm:$0x1]  ;;  %s690_s4 = sld [smem:[#allocation6 + $0xa]]  ;;  %s119_s22 = scalar_lea.vmem [#allocation10], %s680_s10 }
  0x50   :  { %v120_v19 = vld [vmem:[%s119_s22] sm:$0x1]  ;;  %v129_v20 = vadd.f32 %v116_v18, %v112_v17  ;;  %s691_s23 = sld [smem:[#allocation6 + $0xb]]  ;;  %s123_s24 = scalar_lea.vmem [#allocation10], %s681_s12  ;;  %v857_v17 = vmov 1966171168  }
  0x51   :  { %v124_v21 = vld [vmem:[%s123_s24] sm:$0x1]  ;;  %s696_s3 = sld [smem:[#allocation5 + $0x3]]  ;;  %s127_s25 = scalar_lea.vmem [#allocation10], %s682_s14  ;;  %v415_v18 = vunpack.c.l.s4 %v857_v17 }
  0x52   :  { %v128_v22 = vld [vmem:[%s127_s25] sm:$0x1]  ;;  %v130_v23 = vadd.f32 %v124_v21, %v120_v19  ;;  %s697_s26 = sld [smem:[#allocation6 + $0xc]]  ;;  %s153_s27 = scalar_lea.vmem [#allocation8], %s687_s16 }
  0x53   :  { %v154_v24 = vld [vmem:[%s153_s27] sm:$0x1]  ;;  %s698_s28 = sld [smem:[#allocation6 + $0xd]]  ;;  %s157_s29 = scalar_lea.vmem [#allocation10], %s688_s18 }
  0x54   :  { %v131_v25 = vadd.f32 %v130_v23, %v129_v20  ;;  %v158_v26 = vld [vmem:[%s157_s29] sm:$0x1]  ;;  %s699_s5 = sld [smem:[#allocation6 + $0xe]]  ;;  %s161_s30 = scalar_lea.vmem [#allocation10], %s689_s20 }
  0x55   :  { %v162_v27 = vld [vmem:[%s161_s30] sm:$0x1]  ;;  %v171_v28 = vadd.f32 %v158_v26, %v154_v24  ;;  %s700_s7 = sld [smem:[#allocation6 + $0xf]]  ;;  %s165_s0 = scalar_lea.vmem [#allocation10], %s690_s4  ;;  %v416_v24 = vunpack.c.0.s8 %v415_v18 }
  0x56   :  { %v132_v29 = vadd.f32 %v131_v25, %v128_v22  ;;  %v166_v30 = vld [vmem:[%s165_s0] sm:$0x1]  ;;  %s705_s1 = sld [smem:[#allocation5 + $0x4]]  ;;  %s169_s2 = scalar_lea.vmem [#allocation10], %s691_s23 }
  0x57   :  { %v170_v31 = vld [vmem:[%s169_s2] sm:$0x1]  ;;  %v172_v32 = vadd.f32 %v166_v30, %v162_v27  ;;  %s706_s8 = sld [smem:[#allocation6 + $0x10]]  ;;  %s195_s9 = scalar_lea.vmem [#allocation8], %s696_s3 }
  0x58   :  { %133 = vst [vmem:[#allocation2 + $0x1] sm:$0x1] %v132_v29  ;;  %v196_v33 = vld [vmem:[%s195_s9] sm:$0x1]  ;;  %s707_s10 = sld [smem:[#allocation6 + $0x11]]  ;;  %s199_s11 = scalar_lea.vmem [#allocation10], %s697_s26  ;;  %v943_v29 = vsub.s32 %v416_v24, %v911_v1 }
  0x59   :  { %v173_v34 = vadd.f32 %v172_v32, %v171_v28  ;;  %v200_v35 = vld [vmem:[%s199_s11] sm:$0x1]  ;;  %s708_s12 = sld [smem:[#allocation6 + $0x12]]  ;;  %s203_s13 = scalar_lea.vmem [#allocation10], %s698_s28 }
  0x5a   :  { %v204_v36 = vld [vmem:[%s203_s13] sm:$0x1]  ;;  %v213_v37 = vadd.f32 %v200_v35, %v196_v33  ;;  %s709_s14 = sld [smem:[#allocation6 + $0x13]]  ;;  %s207_s15 = scalar_lea.vmem [#allocation10], %s699_s5 }
  0x5b   :  { %v174_v38 = vadd.f32 %v173_v34, %v170_v31  ;;  %v208_v39 = vld [vmem:[%s207_s15] sm:$0x1]  ;;  %s714_s16 = sld [smem:[#allocation5 + $0x5]]  ;;  %s211_s17 = scalar_lea.vmem [#allocation10], %s700_s7 }
  0x5c   :  { %v212_v40 = vld [vmem:[%s211_s17] sm:$0x1]  ;;  %v214_v41 = vadd.f32 %v208_v39, %v204_v36  ;;  %s715_s18 = sld [smem:[#allocation6 + $0x14]]  ;;  %s237_s19 = scalar_lea.vmem [#allocation8], %s705_s1  ;;  %v957_v36 = vsub.s32 0, %v911_v1 }
  0x5d   :  { %175 = vst [vmem:[#allocation2 + $0x2] sm:$0x1] %v174_v38  ;;  %v238_v42 = vld [vmem:[%s237_s19] sm:$0x1]  ;;  %s716_s20 = sld [smem:[#allocation6 + $0x15]]  ;;  %s241_s21 = scalar_lea.vmem [#allocation10], %s706_s8 }
  0x5e   :  { %v215_v43 = vadd.f32 %v214_v41, %v213_v37  ;;  %v242_v44 = vld [vmem:[%s241_s21] sm:$0x1]  ;;  %s717_s4 = sld [smem:[#allocation6 + $0x16]]  ;;  %s245_s22 = scalar_lea.vmem [#allocation10], %s707_s10  ;;  %v404_v39 = vld [vmem:[#allocation3] sm:$0xf] }
  0x5f   :  { %v246_v45 = vld [vmem:[%s245_s22] sm:$0x1]  ;;  %v255_v46 = vadd.f32 %v242_v44, %v238_v42  ;;  %s718_s23 = sld [smem:[#allocation6 + $0x17]]  ;;  %s249_s24 = scalar_lea.vmem [#allocation10], %s708_s12 }
  0x60   :  { %v216_v47 = vadd.f32 %v215_v43, %v212_v40  ;;  %v250_v48 = vld [vmem:[%s249_s24] sm:$0x1]  ;;  %s723_s3 = sld [smem:[#allocation5 + $0x6]]  ;;  %s253_s25 = scalar_lea.vmem [#allocation10], %s709_s14 }
  0x61   :  { %v254_v49 = vld [vmem:[%s253_s25] sm:$0x1]  ;;  %v256_v50 = vadd.f32 %v250_v48, %v246_v45  ;;  %s724_s26 = sld [smem:[#allocation6 + $0x18]]  ;;  %s279_s27 = scalar_lea.vmem [#allocation8], %s714_s16 }
  0x62   :  { %217 = vst [vmem:[#allocation2 + $0x3] sm:$0x1] %v216_v47  ;;  %v280_v51 = vld [vmem:[%s279_s27] sm:$0x1]  ;;  %s725_s28 = sld [smem:[#allocation6 + $0x19]]  ;;  %s283_s29 = scalar_lea.vmem [#allocation10], %s715_s18 }
  0x63   :  { %v257_v52 = vadd.f32 %v256_v50, %v255_v46  ;;  %v284_v53 = vld [vmem:[%s283_s29] sm:$0x1]  ;;  %s726_s5 = sld [smem:[#allocation6 + $0x1a]]  ;;  %s287_s30 = scalar_lea.vmem [#allocation10], %s716_s20 }
  0x64   :  { %v288_v54 = vld [vmem:[%s287_s30] sm:$0x1]  ;;  %v297_v55 = vadd.f32 %v284_v53, %v280_v51  ;;  %s727_s7 = sld [smem:[#allocation6 + $0x1b]]  ;;  %s291_s0 = scalar_lea.vmem [#allocation10], %s717_s4 }
  0x65   :  { %v258_v56 = vadd.f32 %v257_v52, %v254_v49  ;;  %v292_v57 = vld [vmem:[%s291_s0] sm:$0x1]  ;;  %s732_s1 = sld [smem:[#allocation5 + $0x7]]  ;;  %s295_s2 = scalar_lea.vmem [#allocation10], %s718_s23 }
  0x66   :  { %v296_v58 = vld [vmem:[%s295_s2] sm:$0x1]  ;;  %v298_v59 = vadd.f32 %v292_v57, %v288_v54  ;;  %s733_s8 = sld [smem:[#allocation6 + $0x1c]]  ;;  %s321_s9 = scalar_lea.vmem [#allocation8], %s723_s3 }
  0x67   :  { %259 = vst [vmem:[#allocation2 + $0x4] sm:$0x1] %v258_v56  ;;  %v322_v60 = vld [vmem:[%s321_s9] sm:$0x1]  ;;  %s734_s10 = sld [smem:[#allocation6 + $0x1d]]  ;;  %s325_s11 = scalar_lea.vmem [#allocation10], %s724_s26 }
  0x68   :  { %v299_v61 = vadd.f32 %v298_v59, %v297_v55  ;;  %v326_v62 = vld [vmem:[%s325_s11] sm:$0x1]  ;;  %s735_s12 = sld [smem:[#allocation6 + $0x1e]]  ;;  %s329_s13 = scalar_lea.vmem [#allocation10], %s725_s28 }
  0x69   :  { %v330_v63 = vld [vmem:[%s329_s13] sm:$0x1]  ;;  %v339_v0 = vadd.f32 %v326_v62, %v322_v60  ;;  %s736_s14 = sld [smem:[#allocation6 + $0x1f]]  ;;  %s333_s15 = scalar_lea.vmem [#allocation10], %s726_s5 }
  0x6a   :  { %v300_v2 = vadd.f32 %v299_v61, %v296_v58  ;;  %v334_v4 = vld [vmem:[%s333_s15] sm:$0x1]  ;;  %s337_s16 = scalar_lea.vmem [#allocation10], %s727_s7  ;;  %s692_s17 = sld [smem:[#allocation7 + $0x8]] }
  0x6b   :  { %v338_v5 = vld [vmem:[%s337_s16] sm:$0x1]  ;;  %v340_v6 = vadd.f32 %v334_v4, %v330_v63  ;;  %s363_s18 = scalar_lea.vmem [#allocation8], %s732_s1  ;;  %s693_s19 = sld [smem:[#allocation7 + $0x9]] }
  0x6c   :  { %301 = vst [vmem:[#allocation2 + $0x5] sm:$0x1] %v300_v2  ;;  %v364_v7 = vld [vmem:[%s363_s18] sm:$0x1]  ;;  %s367_s20 = scalar_lea.vmem [#allocation10], %s733_s8  ;;  %s694_s21 = sld [smem:[#allocation7 + $0xa]] }
  0x6d   :  { %v341_v8 = vadd.f32 %v340_v6, %v339_v0  ;;  %v368_v9 = vld [vmem:[%s367_s20] sm:$0x1]  ;;  %s371_s4 = scalar_lea.vmem [#allocation10], %s734_s10  ;;  %s695_s22 = sld [smem:[#allocation7 + $0xb]] }
  0x6e   :  { %v372_v10 = vld [vmem:[%s371_s4] sm:$0x1]  ;;  %v381_v11 = vadd.f32 %v368_v9, %v364_v7  ;;  %s375_s23 = scalar_lea.vmem [#allocation10], %s735_s12  ;;  %s916_s24 = sld [smem:[#allocation7 + $0x4]] }
  0x6f   :  { %v342_v12 = vadd.f32 %v341_v8, %v338_v5  ;;  %v376_v13 = vld [vmem:[%s375_s23] sm:$0x1]  ;;  %s918_s3 = sld [smem:[#allocation7 + $0x5]]  ;;  %s379_s25 = scalar_lea.vmem [#allocation10], %s736_s14 }
  0x70   :  { %v382_v14 = vadd.f32 %v376_v13, %v372_v10  ;;  %v380_v15 = vld [vmem:[%s379_s25] sm:$0x1]  ;;  %s920_s26 = sld [smem:[#allocation7 + $0x6]]  ;;  %s177_s27 = scalar_lea.vmem [#allocation12], %s692_s17 }
  0x71   :  { %343 = vst [vmem:[#allocation2 + $0x6] sm:$0x1] %v342_v12  ;;  %v178_v19 = vld [vmem:[%s177_s27] sm:$0x1]  ;;  %s922_s28 = sld [smem:[#allocation7 + $0x7]]  ;;  %s182_s29 = scalar_lea.vmem [#allocation12], %s693_s19 }
  0x72   :  { %v383_v16 = vadd.f32 %v382_v14, %v381_v11  ;;  %180 = vst [vmem:[#allocation3 + $0x8] sm:$0x1] %v178_v19  ;;  %v183_v20 = vld [vmem:[%s182_s29] sm:$0x1]  ;;  %s924_s5 = sld [smem:[#allocation7 + $0xc]]  ;;  %s186_s30 = scalar_lea.vmem [#allocation12], %s694_s21 }
  0x73   :  { %184 = vst [vmem:[#allocation3 + $0x9] sm:$0x1] %v183_v20  ;;  %v187_v22 = vld [vmem:[%s186_s30] sm:$0x1]  ;;  %s926_s7 = sld [smem:[#allocation7 + $0xd]]  ;;  %s190_s0 = scalar_lea.vmem [#allocation12], %s695_s22 }
  0x74   :  { %v384_v21 = vadd.f32 %v383_v16, %v380_v15  ;;  %188 = vst [vmem:[#allocation3 + $0xa] sm:$0x1] %v187_v22  ;;  %v191_v23 = vld [vmem:[%s190_s0] sm:$0x1]  ;;  %s928_s1 = sld [smem:[#allocation7 + $0xe]]  ;;  %s135_s2 = scalar_lea.vmem [#allocation12], %s916_s24 }
  0x75   :  { %192 = vst [vmem:[#allocation3 + $0xb] sm:$0x1] %v191_v23  ;;  %v136_v25 = vld [vmem:[%s135_s2] sm:$0x1]  ;;  %s931_s8 = sld [smem:[#allocation7 + $0xf]]  ;;  %s140_s9 = scalar_lea.vmem [#allocation12], %s918_s3 }
  0x76   :  { %385 = vst [vmem:[#allocation2 + $0x7] sm:$0x1] %v384_v21  ;;  %138 = vst [vmem:[#allocation3 + $0x4] sm:$0x1] %v136_v25  ;;  %v141_v26 = vld [vmem:[%s140_s9] sm:$0x1] }
  0x77   :  { %s934_s10 = sld [smem:[#allocation7 + $0x10]]  ;;  %142 = vst [vmem:[#allocation3 + $0x5] sm:$0x1] %v141_v26  ;;  %s144_s11 = scalar_lea.vmem [#allocation12], %s920_s26 }
  0x78   :  { %v145_v27 = vld [vmem:[%s144_s11] sm:$0x1]  ;;  %s937_s12 = sld [smem:[#allocation7 + $0x11]]  ;;  %s148_s13 = scalar_lea.vmem [#allocation12], %s922_s28 }
  0x79   :  { %146 = vst [vmem:[#allocation3 + $0x6] sm:$0x1] %v145_v27  ;;  %v149_v28 = vld [vmem:[%s148_s13] sm:$0x1]  ;;  %s940_s14 = sld [smem:[#allocation7 + $0x12]]  ;;  %s219_s15 = scalar_lea.vmem [#allocation12], %s924_s5 }
  0x7a   :  { %150 = vst [vmem:[#allocation3 + $0x7] sm:$0x1] %v149_v28  ;;  %v220_v30 = vld [vmem:[%s219_s15] sm:$0x1]  ;;  %s946_s16 = sld [smem:[#allocation7 + $0x13]]  ;;  %s224_s17 = scalar_lea.vmem [#allocation12], %s926_s7 }
  0x7b   :  { %222 = vst [vmem:[#allocation3 + $0xc] sm:$0x1] %v220_v30  ;;  %v225_v31 = vld [vmem:[%s224_s17] sm:$0x1]  ;;  %s949_s18 = sld [smem:[#allocation7 + $0x14]]  ;;  %s228_s19 = scalar_lea.vmem [#allocation12], %s928_s1 }
  0x7c   :  { %226 = vst [vmem:[#allocation3 + $0xd] sm:$0x1] %v225_v31  ;;  %v229_v32 = vld [vmem:[%s228_s19] sm:$0x1]  ;;  %s952_s20 = sld [smem:[#allocation7 + $0x15]]  ;;  %s232_s21 = scalar_lea.vmem [#allocation12], %s931_s8 }
  0x7d   :  { %v403_v33 = vld [vmem:[#allocation2] sm:$0xff]  ;;  %230 = vst [vmem:[#allocation3 + $0xe] sm:$0x1] %v229_v32  ;;  %s261_s4 = scalar_lea.vmem [#allocation12], %s934_s10  ;;  %s960_s22 = sld [smem:[#allocation7 + $0x16]] }
  0x7e   :  { %v233_v34 = vld [vmem:[%s232_s21] sm:$0x1]  ;;  %v420_v35 = vrot.slane %v403_v33, %v943_v29  ;;  %v413_v37 = vcombine.high %v403_v33, %v403_v33  ;;  %s266_s23 = scalar_lea.vmem [#allocation12], %s937_s12  ;;  %s963_s24 = sld [smem:[#allocation7 + $0x17]]  ;;  %v406_v44 = vld [vmem:[#allocation3 + $0x8] sm:$0xf] }
  0x7f   :  { %234 = vst [vmem:[#allocation3 + $0xf] sm:$0x1] %v233_v34  ;;  %v262_v38 = vld [vmem:[%s261_s4] sm:$0x1]  ;;  %s270_s3 = scalar_lea.vmem [#allocation12], %s940_s14  ;;  %s968_s25 = sld [smem:[#allocation7 + $0x18]] }
  0x80   :  { %264 = vst [vmem:[#allocation3 + $0x10] sm:$0x1] %v262_v38  ;;  %v267_v40 = vld [vmem:[%s266_s23] sm:$0x1]  ;;  %v436_v41 = vrot.slane %v420_v35, %v943_v29  ;;  %v428_v42 = vcombine.high %v420_v35, %v420_v35  ;;  %v427_v43 = vrot.slane %v413_v37, %v943_v29  ;;  %s274_s26 = scalar_lea.vmem [#allocation12], %s946_s16  ;;  %s977_s28 = sld [smem:[#allocation7 + $0x19]] }
  0x81   :  { %268 = vst [vmem:[#allocation3 + $0x11] sm:$0x1] %v267_v40  ;;  %v271_v1 = vld [vmem:[%s270_s3] sm:$0x1]  ;;  %s303_s27 = scalar_lea.vmem [#allocation12], %s949_s18  ;;  %s980_s5 = sld [smem:[#allocation7 + $0x1a]] }
  0x82   :  { %272 = vst [vmem:[#allocation3 + $0x12] sm:$0x1] %v271_v1  ;;  %v275_v45 = vld [vmem:[%s274_s26] sm:$0x1]  ;;  %v465_v46 = vrot.slane %v436_v41, %v957_v36  ;;  %v458_v47 = vcombine.high %v436_v41, %v436_v41  ;;  %v450_v48 = vrot.slane %v428_v42, %v943_v29  ;;  %v974_v49 = vrot.slane %v427_v43, %v943_v29  ;;  %v405_v51 = vld [vmem:[#allocation3 + $0x4] sm:$0xf] }
  0x83   :  { %276 = vst [vmem:[#allocation3 + $0x13] sm:$0x1] %v275_v45  ;;  %v304_v50 = vld [vmem:[%s303_s27] sm:$0x1]  ;;  %s308_s29 = scalar_lea.vmem [#allocation12], %s952_s20  ;;  %v429_v53 = vcombine.high %v427_v43, %v427_v43  ;;  %s984_s30 = sld [smem:[#allocation7 + $0x1b]] }
  0x84   :  { %306 = vst [vmem:[#allocation3 + $0x14] sm:$0x1] %v304_v50  ;;  %v309_v52 = vld [vmem:[%s308_s29] sm:$0x1]  ;;  %v502_v54 = vmul.f32 %v465_v46, %v404_v39  ;;  %v473_v55 = vrot.slane %v458_v47, %v957_v36  ;;  %v469_v56 = vrot.slane %v450_v48, %v957_v36  ;;  %v460_v57 = vcombine.high %v450_v48, %v450_v48  ;;  %s312_s7 = scalar_lea.vmem [#allocation12], %s960_s22  ;;  %s316_s0 = scalar_lea.vmem [#allocation12], %s963_s24 }
  0x85   :  { %310 = vst [vmem:[#allocation3 + $0x15] sm:$0x1] %v309_v52  ;;  %v481_v59 = vrot.slane %v974_v49, %v957_v36  ;;  %v313_v60 = vld [vmem:[%s312_s7] sm:$0x1]  ;;  %s992_s1 = sld [smem:[#allocation7 + $0x1c]]  ;;  %v457_v4 = vrot.slane %v429_v53, %v943_v29  ;;  %s345_s2 = scalar_lea.vmem [#allocation12], %s968_s25  ;;  %v459_v17 = vcombine.high %v974_v49, %v974_v49 }
  0x86   :  { %v407_v58 = vld [vmem:[#allocation3 + $0xc] sm:$0xf]  ;;  %v511_v61 = vsel %vm510_vm0, %v502_v54, 0.0  ;;  %v504_v62 = vmul.f32 %v473_v55, %v406_v44  ;;  %v503_v63 = vmul.f32 %v469_v56, %v405_v51  ;;  %v477_v0 = vrot.slane %v460_v57, %v957_v36  ;;  %314 = vst [vmem:[#allocation3 + $0x16] sm:$0x1] %v313_v60  ;;  %s996_s8 = sld [smem:[#allocation7 + $0x1d]] }
  0x87   :  { %v317_v2 = vld [vmem:[%s316_s0] sm:$0x1]  ;;  %512 = vadd.xlane.f32.xlu0 %v511_v61  ;;  %s1000_s9 = sld [smem:[#allocation7 + $0x1e]]  ;;  %s350_s10 = scalar_lea.vmem [#allocation12], %s977_s28  ;;  %v485_v14 = vrot.slane %v457_v4, %v957_v36  ;;  %v489_v23 = vrot.slane %v459_v17, %v957_v36  ;;  %v461_v26 = vcombine.high %v457_v4, %v457_v4 }
  0x88   :  { %318 = vst [vmem:[#allocation3 + $0x17] sm:$0x1] %v317_v2  ;;  %v346_v5 = vld [vmem:[%s345_s2] sm:$0x1]  ;;  %v517_v6 = vsel %vm510_vm0, %v504_v62, 0.0  ;;  %v514_v7 = vsel %vm510_vm0, %v503_v63, 0.0  ;;  %v505_v8 = vmul.f32 %v477_v0, %v407_v58 }
  0x89   :  { %348 = vst [vmem:[#allocation3 + $0x18] sm:$0x1] %v346_v5  ;;  %518 = vadd.xlane.f32.xlu1 %v517_v6  ;;  %v351_v10 = vld [vmem:[%s350_s10] sm:$0x1]  ;;  %s354_s11 = scalar_lea.vmem [#allocation12], %s980_s5  ;;  %s740_s12 = sld [smem:[#allocation7 + $0x1f]]  ;;  %v493_v30 = vrot.slane %v461_v26, %v957_v36 }
  0x8a   :  { %v408_v9 = vld [vmem:[#allocation3 + $0x10] sm:$0xf]  ;;  %v520_v11 = vsel %vm510_vm0, %v505_v8, 0.0  ;;  %352 = vst [vmem:[#allocation3 + $0x19] sm:$0x1] %v351_v10  ;;  %s358_s13 = scalar_lea.vmem [#allocation12], %s984_s30 }
  0x8b   :  { %v506_v12 = vmul.f32 %v481_v59, %v408_v9  ;;  %v355_v13 = vld [vmem:[%s354_s11] sm:$0x1]  ;;  %515 = vadd.xlane.f32.xlu0 %v514_v7  ;;  %s387_s14 = scalar_lea.vmem [#allocation12], %s992_s1 }
  0x8c   :  { %356 = vst [vmem:[#allocation3 + $0x1a] sm:$0x1] %v355_v13  ;;  %v359_v15 = vld [vmem:[%s358_s13] sm:$0x1]  ;;  %s392_s15 = scalar_lea.vmem [#allocation12], %s996_s8 }
  0x8d   :  { %v523_v16 = vsel %vm510_vm0, %v506_v12, 0.0  ;;  %360 = vst [vmem:[#allocation3 + $0x1b] sm:$0x1] %v359_v15  ;;  %521 = vadd.xlane.f32.xlu1 %v520_v11  ;;  %v388_v18 = vld [vmem:[%s387_s14] sm:$0x1]  ;;  %s396_s16 = scalar_lea.vmem [#allocation12], %s1000_s9 }
  0x8e   :  { %390 = vst [vmem:[#allocation3 + $0x1c] sm:$0x1] %v388_v18  ;;  %v393_v20 = vld [vmem:[%s392_s15] sm:$0x1] }
  0x8f   :  { %v409_v19 = vld [vmem:[#allocation3 + $0x14] sm:$0xf]  ;;  %524 = vadd.xlane.f32.xlu0 %v523_v16  ;;  %394 = vst [vmem:[#allocation3 + $0x1d] sm:$0x1] %v393_v20  ;;  %v397_v22 = vld [vmem:[%s396_s16] sm:$0x1] }
  0x90   :  { %v507_v21 = vmul.f32 %v485_v14, %v409_v19  ;;  %398 = vst [vmem:[#allocation3 + $0x1e] sm:$0x1] %v397_v22  ;;  %s400_s17 = scalar_lea.vmem [#allocation12], %s740_s12 }
  0x91   :  { %v401_v25 = vld [vmem:[%s400_s17] sm:$0x1] }
  0x92   :  { %v526_v24 = vsel %vm510_vm0, %v507_v21, 0.0  ;;  %402 = vst [vmem:[#allocation3 + $0x1f] sm:$0x1] %v401_v25 }
  0x93   :  { %527 = vadd.xlane.f32.xlu1 %v526_v24 }
  0x94   :  { %v410_v27 = vld [vmem:[#allocation3 + $0x18] sm:$0xf] }
  0x95   :  { %v508_v28 = vmul.f32 %v489_v23, %v410_v27 }
  0x97   :  { %v529_v29 = vsel %vm510_vm0, %v508_v28, 0.0 }
  0x98   :  { %530 = vadd.xlane.f32.xlu0 %v529_v29 }
  0x99   :  { %v411_v31 = vld [vmem:[#allocation3 + $0x1c] sm:$0xf] }
  0x9a   :  { %v509_v32 = vmul.f32 %v493_v30, %v411_v31 }
  0x9c   :  { %v532_v33 = vsel %vm510_vm0, %v509_v32, 0.0 }
  0x9d   :  { %533 = vadd.xlane.f32.xlu1 %v532_v33 }
 0x110   :  { %v513_v34 = vpop.xlane.xlu0 %512 }
 0x111   :  { %v548_v38 = vrot.slane %v513_v34, %v914_v3 }
 0x112   :  { %v519_v35 = vpop.xlane.xlu1 %518 }
 0x113   :  { %v556_v42 = vrot.slane %v519_v35, %v914_v3 }
 0x114   :  { %v516_v37 = vpop.xlane.xlu0 %515 }
 0x115   :  { %v552_v39 = vrot.slane %v516_v37, %v914_v3 }
 0x116   :  { %v522_v40 = vpop.xlane.xlu1 %521 }
 0x117   :  { %v578_v41 = vsel %vm577_vm1, %v552_v39, %v548_v38  ;;  %v560_v36 = vrot.slane %v522_v40, %v914_v3 }
 0x118   :  { %v525_v1 = vpop.xlane.xlu0 %524  ;;  %v580_v43 = vsel %vm579_vm2, %v556_v42, %v578_v41 }
 0x119   :  { %v564_v44 = vrot.slane %v525_v1, %v914_v3  ;;  %v582_v46 = vsel %vm581_vm3, %v560_v36, %v580_v43 }
 0x11b   :  { %v584_v48 = vsel %vm583_vm4, %v564_v44, %v582_v46 }
 0x11c   :  { %v528_v45 = vpop.xlane.xlu1 %527 }
 0x11d   :  { %v568_v47 = vrot.slane %v528_v45, %v914_v3 }
 0x11f   :  { %v586_v51 = vsel %vm585_vm5, %v568_v47, %v584_v48 }
 0x121   :  { %v531_v49 = vpop.xlane.xlu0 %530 }
 0x122   :  { %v572_v50 = vrot.slane %v531_v49, %v914_v3 }
 0x124   :  { %v588_v52 = vsel %vm587_vm6, %v572_v50, %v586_v51 }
 0x126   :  { %v534_v53 = vpop.xlane.xlu1 %533 }
 0x127   :  { %v576_v54 = vrot.slane %v534_v53, %v914_v3 }
 0x129   :  { %v590_v55 = vsel %vm589_vm7, %v576_v54, %v588_v52 }
 0x12a   :  { %593 = vst.msk [vmem:[%s1033_s6] sm:$0xff] %vm592_vm8, %v590_v55 }
 0x12b   :  { %598 = vsyncpa [#allocation9], 1 }
 0x12c   :  { %599 = vsyncpa [#allocation11], 1 }

</bundles_post_ra>
